<compile_context>
chip_gen: v5e
topology: v5e:2x2
jax: 0.10.0
libtpu: 0.0.40
codegen_flags: <defaults>
</compile_context>

<pallas_src>
import functools

import jax
import jax.numpy as jnp
from jax.experimental import pallas as pl
from jax.experimental.pallas import tpu as pltpu


# --------------------------------------------------------------------------
# Pallas kernel: (conv1x1 w/ folded BN scale -> +shift -> ReLU) x 2
#                -> max over the k neighbors -> transposed [C_pad, TG] store
# --------------------------------------------------------------------------
def _sa_mlp_kernel(x_ref, w0_ref, t0_ref, w1_ref, t1_ref, out_ref, *, k):
    rows = x_ref.shape[0]                       # TG * k
    tg = rows // k

    x = x_ref[...]                              # [TG*k, C_in] bf16
    # layer 0: 1x1 conv as matmul (BN scale pre-folded into w0), shift, ReLU
    h = jnp.dot(x, w0_ref[...], preferred_element_type=jnp.float32)
    h = jnp.maximum(h + t0_ref[...], 0.0)       # [TG*k, C0] f32
    # layer 1
    h = jnp.dot(h.astype(jnp.bfloat16), w1_ref[...],
                preferred_element_type=jnp.float32)
    h = jnp.maximum(h + t1_ref[...], 0.0)       # [TG*k, C_pad] f32

    c_pad = h.shape[-1]
    # MaxPool2d([1, k]) over the k neighbors of each group (reshape only at
    # the very end; with k=8 and C_pad a multiple of 128 this is a clean
    # sublane regrouping, no relayout).
    m = jnp.max(h.reshape(tg, k, c_pad), axis=1)            # [TG, C_pad]
    # Lane-dense transposed store: lane axis = groups (TG, multiple of 128).
    out_ref[...] = jnp.transpose(m, (1, 0)).astype(out_ref.dtype)


def sa_mlp_maxpool(x_flat, params, k, *, tile_groups=256):
    """x_flat: [G*k, C_in].  params: [(W[Ci,Co], scale[Co], shift[Co])] * 2.

    Returns the pooled features channels-major: [C_last, G] float32.
    """
    rows, cin = x_flat.shape
    G = rows // k
    (w0, s0, t0), (w1, s1, t1) = params
    c0, c_last = w0.shape[1], w1.shape[1]

    # Fold BN scale into the conv weights (one VPU multiply per element per
    # layer removed, two small per-step operands dropped); bf16 matmul inputs.
    w0f = (w0 * s0[None, :]).astype(jnp.bfloat16)
    w1f = (w1 * s1[None, :]).astype(jnp.bfloat16)
    t0r = t0.reshape(1, c0).astype(jnp.float32)
    t1r = t1.reshape(1, c_last).astype(jnp.float32)

    # Pad output channels to a multiple of 128 so the (transposed) output tile
    # has a clean sublane extent and the in-kernel transpose stays (8,128)
    # aligned.  Padded channels are zeros and get sliced off below.
    c_pad = 128 * pl.cdiv(c_last, 128)
    if c_pad != c_last:
        w1f = jnp.pad(w1f, ((0, 0), (0, c_pad - c_last)))
        t1r = jnp.pad(t1r, ((0, 0), (0, c_pad - c_last)))

    # Group tile: multiple of 128 (lane axis of the transposed output), large
    # enough that TG*k >= ~2K rows so per-grid-step overhead is amortized, but
    # no larger than the (padded) problem.
    tg = min(tile_groups, 128 * pl.cdiv(G, 128))
    tg = max(128, (tg // 128) * 128)
    g_pad = tg * pl.cdiv(G, tg)

    x_flat = x_flat.astype(jnp.bfloat16)        # halves the dominant HBM read
    if g_pad != G:
        x_flat = jnp.pad(x_flat, ((0, (g_pad - G) * k), (0, 0)))

    def full(arr):
        return pl.BlockSpec(arr.shape, lambda i: (0, 0))

    out = pl.pallas_call(
        functools.partial(_sa_mlp_kernel, k=k),
        out_shape=jax.ShapeDtypeStruct((c_pad, g_pad), jnp.float32),
        grid_spec=pltpu.PrefetchScalarGridSpec(
            num_scalar_prefetch=0,
            grid=(g_pad // tg,),
            in_specs=[
                pl.BlockSpec((tg * k, cin), lambda i: (i, 0)),
                full(w0f), full(t0r), full(w1f), full(t1r),
            ],
            out_specs=pl.BlockSpec((c_pad, tg), lambda i: (0, i)),
        ),
        compiler_params=pltpu.CompilerParams(
            dimension_semantics=("parallel",),
            vmem_limit_bytes=32 * 1024 * 1024),
    )(x_flat, w0f, t0r, w1f, t1r)

    return out[:c_last, :G]                     # drop channel / group padding


# --------------------------------------------------------------------------
# Plain-JAX glue: ball query + grouping (data-dependent gather)
# --------------------------------------------------------------------------
def ball_point(p, q, radius, k):
    """p: [B, N, 3], q: [B, M, 3] -> int32 index [B, M, k] (first k in ball,
    padded with the first valid index; falls back to nearest point)."""
    n = p.shape[1]
    d2 = jnp.sum((q[:, :, None, :] - p[:, None, :, :]) ** 2, axis=-1)  # [B,M,N]
    within = d2 <= radius * radius
    key = jnp.where(within, jnp.arange(n, dtype=jnp.int32)[None, None, :], n)
    # k smallest keys (ascending) via top_k of the negation -- avoids a full
    # O(N log N) sort over the neighbor axis.
    neg_top, _ = jax.lax.top_k(-key, k)
    order = -neg_top                                                   # [B,M,k]
    nearest = jnp.argmin(d2, axis=-1).astype(jnp.int32)[..., None]
    first = jnp.where(order[..., :1] >= n, nearest, order[..., :1])
    idx = jnp.where(order >= n, first, order)
    return idx.astype(jnp.int32)


def batched_index_select(a, idx):
    """a: [B, N, C], idx: [B, M, k] -> [B, M, k, C]."""
    return jax.vmap(lambda arr, ids: arr[ids])(a, idx)


# --------------------------------------------------------------------------
# Deterministic parameter init (Conv2d 1x1 + BatchNorm2d eval-mode, foldable)
# --------------------------------------------------------------------------
def init_params(key, in_channels, mlp, eps=1e-5):
    params = []
    last = in_channels
    for ch in mlp:
        key, kw, kb = jax.random.split(key, 3)
        bound = 1.0 / float(last) ** 0.5
        w = jax.random.uniform(kw, (last, ch), jnp.float32, -bound, bound)
        b = jax.random.uniform(kb, (ch,), jnp.float32, -bound, bound)
        gamma = jnp.ones((ch,), jnp.float32)
        beta = jnp.zeros((ch,), jnp.float32)
        running_mean = jnp.zeros((ch,), jnp.float32)
        running_var = jnp.ones((ch,), jnp.float32)
        scale = gamma / jnp.sqrt(running_var + eps)
        shift = (b - running_mean) * scale + beta
        params.append((w, scale, shift))
        last = ch
    return params


# --------------------------------------------------------------------------
# Full SetAbstraction forward (radius / ball-query mode)
# --------------------------------------------------------------------------
def set_abstraction_forward(p, q, x, params, radius, k, tile_groups=256):
    B, M = q.shape[0], q.shape[1]
    idx = ball_point(p, q, radius, k)                      # [B, M, k]
    grouped_p = batched_index_select(p, idx)               # [B, M, k, 3]
    p_hat = grouped_p - q[:, :, None, :]                   # relative coords
    x_t = jnp.transpose(x, (0, 2, 1))                      # [B, N, C_feat]
    grouped_x = batched_index_select(x_t, idx)             # [B, M, k, C_feat]
    x_hat = jnp.concatenate([p_hat, grouped_x], axis=-1)   # [B, M, k, C_in]

    cin = x_hat.shape[-1]
    flat = x_hat.reshape(B * M * k, cin)                   # [G*k, C_in]
    out_t = sa_mlp_maxpool(flat, params, k, tile_groups=tile_groups)
    c_last = out_t.shape[0]                                # [C_last, B*M]
    out = out_t.reshape(c_last, B, M).transpose(1, 0, 2)   # [B, C_last, M]
    return q, out


# --------------------------------------------------------------------------
# References for the kernel hot path
# --------------------------------------------------------------------------
def _reference_f32(x_hat_flat3, params):
    """Original (f32) semantics: conv1x1 + BN affine + ReLU, twice, then max."""
    h = x_hat_flat3
    for w, s, t in params:
        h = jnp.maximum(jnp.einsum('gkc,cd->gkd', h, w) * s + t, 0.0)
    return jnp.max(h, axis=1)


def _reference_bf16(x_hat_flat3, params):
    """Mirrors the kernel's numerics (folded bf16 weights, f32 accumulation)."""
    (w0, s0, t0), (w1, s1, t1) = params
    w0f = (w0 * s0[None, :]).astype(jnp.bfloat16)
    w1f = (w1 * s1[None, :]).astype(jnp.bfloat16)
    h = x_hat_flat3.astype(jnp.bfloat16)
    h = jnp.maximum(jnp.einsum('gkc,cd->gkd', h, w0f,
                               preferred_element_type=jnp.float32) + t0, 0.0)
    h = jnp.maximum(jnp.einsum('gkc,cd->gkd', h.astype(jnp.bfloat16), w1f,
                               preferred_element_type=jnp.float32) + t1, 0.0)
    return jnp.max(h, axis=1)


if __name__ == "__main__":
    key = jax.random.PRNGKey(0)
    B, N, M, K = 2, 64, 16, 8
    C_feat = 5
    in_channels = 3 + C_feat          # xyz-offsets concatenated with features
    mlp = [32, 64]
    radius = 2.0                      # unit-cube points -> ball never empty

    kp, kx, kparam = jax.random.split(key, 3)
    p = jax.random.uniform(kp, (B, N, 3), jnp.float32)
    q = p[:, :M, :]                                   # query centroids
    x = jax.random.normal(kx, (B, C_feat, N), jnp.float32)

    params = init_params(kparam, in_channels, mlp)

    q_out, feat = set_abstraction_forward(p, q, x, params, radius, K)
    feat = jax.block_until_ready(feat)

    assert q_out.shape == (B, M, 3)
    assert feat.shape == (B, mlp[-1], M)

    # Rebuild the kernel's input with the same glue and compare.
    idx = ball_point(p, q, radius, K)
    p_hat = batched_index_select(p, idx) - q[:, :, None, :]
    grouped_x = batched_index_select(jnp.transpose(x, (0, 2, 1)), idx)
    flat3 = jnp.concatenate([p_hat, grouped_x], axis=-1).reshape(
        B * M, K, in_channels)

    # Tight check against a reference mirroring the kernel's bf16/f32 numerics.
    ref_b = _reference_bf16(flat3, params).reshape(B, M, mlp[-1]).transpose(0, 2, 1)
    assert jnp.allclose(feat, ref_b, rtol=1e-2, atol=1e-2), "mismatch vs bf16 ref"
    # Loose check against the original full-f32 semantics (bf16 rounding only).
    ref_f = _reference_f32(flat3, params).reshape(B, M, mlp[-1]).transpose(0, 2, 1)
    assert jnp.allclose(feat, ref_f, rtol=5e-2, atol=1e-1), "mismatch vs f32 ref"
    assert bool(jnp.all(jnp.isfinite(feat)))

    print("KERNEL_OK")
</pallas_src>

<mosaic_0001>
module attributes {stable_mosaic.version = 11 : i64} {
  func.func @_sa_mlp_kernel(%arg0: i32, %arg1: memref<1024x8xbf16, #tpu.memory_space<vmem>>, %arg2: memref<8x32xbf16, #tpu.memory_space<vmem>>, %arg3: memref<1x32xf32, #tpu.memory_space<vmem>>, %arg4: memref<32x128xbf16, #tpu.memory_space<vmem>>, %arg5: memref<1x128xf32, #tpu.memory_space<vmem>>, %arg6: memref<128x128xf32, #tpu.memory_space<vmem>>) attributes {dimension_semantics = [#tpu.dimension_semantics<parallel>], iteration_bounds = array<i64: 1>, scalar_prefetch = 0 : i64, scratch_operands = 0 : i64, tpu.core_type = #tpu.core_type<tc>, window_params = [{transform_indices = @transform_0, window_bounds = array<i64: 1024, 8>}, {pipeline_mode = #tpu.pipeline_mode<synchronous>, transform_indices = @transform_1, window_bounds = array<i64: 8, 32>}, {pipeline_mode = #tpu.pipeline_mode<synchronous>, transform_indices = @transform_2, window_bounds = array<i64: 1, 32>}, {pipeline_mode = #tpu.pipeline_mode<synchronous>, transform_indices = @transform_3, window_bounds = array<i64: 32, 128>}, {pipeline_mode = #tpu.pipeline_mode<synchronous>, transform_indices = @transform_4, window_bounds = array<i64: 1, 128>}, {transform_indices = @transform_5, window_bounds = array<i64: 128, 128>}]} {
    %c0 = arith.constant 0 : index
    %c0_0 = arith.constant 0 : index
    %0 = vector.load %arg1[%c0, %c0_0] : memref<1024x8xbf16, #tpu.memory_space<vmem>>, vector<1024x8xbf16>
    %c0_1 = arith.constant 0 : index
    %c0_2 = arith.constant 0 : index
    %1 = vector.load %arg2[%c0_1, %c0_2] : memref<8x32xbf16, #tpu.memory_space<vmem>>, vector<8x32xbf16>
    %cst = arith.constant dense<0.000000e+00> : vector<1024x32xf32>
    %2 = tpu.matmul %0, %1, %cst {dimension_numbers = #tpu.dot_dimension_numbers<[1], [0], [0], [1], [0, 0, 1, 1], [], []>} : vector<1024x8xbf16>, vector<8x32xbf16>, vector<1024x32xf32> -> vector<1024x32xf32>
    %c0_3 = arith.constant 0 : index
    %c0_4 = arith.constant 0 : index
    %3 = vector.load %arg3[%c0_3, %c0_4] : memref<1x32xf32, #tpu.memory_space<vmem>>, vector<1x32xf32>
    %4 = vector.broadcast %3 : vector<1x32xf32> to vector<1024x32xf32>
    %5 = arith.addf %2, %4 : vector<1024x32xf32>
    %cst_5 = arith.constant 0.000000e+00 : f32
    %6 = vector.broadcast %cst_5 : f32 to vector<1024x32xf32>
    %7 = arith.maximumf %5, %6 : vector<1024x32xf32>
    %8 = arith.truncf %7 : vector<1024x32xf32> to vector<1024x32xbf16>
    %c0_6 = arith.constant 0 : index
    %c0_7 = arith.constant 0 : index
    %9 = vector.load %arg4[%c0_6, %c0_7] : memref<32x128xbf16, #tpu.memory_space<vmem>>, vector<32x128xbf16>
    %cst_8 = arith.constant dense<0.000000e+00> : vector<1024x128xf32>
    %10 = tpu.matmul %8, %9, %cst_8 {dimension_numbers = #tpu.dot_dimension_numbers<[1], [0], [0], [1], [0, 0, 1, 1], [], []>} : vector<1024x32xbf16>, vector<32x128xbf16>, vector<1024x128xf32> -> vector<1024x128xf32>
    %c0_9 = arith.constant 0 : index
    %c0_10 = arith.constant 0 : index
    %11 = vector.load %arg5[%c0_9, %c0_10] : memref<1x128xf32, #tpu.memory_space<vmem>>, vector<1x128xf32>
    %12 = vector.broadcast %11 : vector<1x128xf32> to vector<1024x128xf32>
    %13 = arith.addf %10, %12 : vector<1024x128xf32>
    %cst_11 = arith.constant 0.000000e+00 : f32
    %14 = vector.broadcast %cst_11 : f32 to vector<1024x128xf32>
    %15 = arith.maximumf %13, %14 : vector<1024x128xf32>
    %16 = vector.shape_cast %15 : vector<1024x128xf32> to vector<128x8x128xf32>
    %cst_12 = arith.constant dense<0xFF800000> : vector<128x128xf32>
    %17 = vector.multi_reduction <maximumf>, %16, %cst_12 [1] : vector<128x8x128xf32> to vector<128x128xf32>
    %18 = tpu.transpose %17, [1, 0] : vector<128x128xf32> -> vector<128x128xf32>
    %c0_13 = arith.constant 0 : index
    %c0_14 = arith.constant 0 : index
    %19 = vector.load %arg6[%c0_13, %c0_14] : memref<128x128xf32, #tpu.memory_space<vmem>>, vector<128x128xf32>
    tpu.vector_store %arg6[%c0_13, %c0_14], %18 {strides = array<i32>} : memref<128x128xf32, #tpu.memory_space<vmem>>, vector<128x128xf32>,
    return
  }
  func.func @transform_0(%arg0: i32) -> (i32, i32) {
    %c0_i32 = arith.constant 0 : i32
    %c0_i32_0 = arith.constant 0 : i32
    return %arg0, %c0_i32 : i32, i32
  }
  func.func @transform_1(%arg0: i32) -> (i32, i32) {
    %c0_i32 = arith.constant 0 : i32
    %c0_i32_0 = arith.constant 0 : i32
    %c0_i32_1 = arith.constant 0 : i32
    return %c0_i32, %c0_i32_0 : i32, i32
  }
  func.func @transform_2(%arg0: i32) -> (i32, i32) {
    %c0_i32 = arith.constant 0 : i32
    %c0_i32_0 = arith.constant 0 : i32
    %c0_i32_1 = arith.constant 0 : i32
    return %c0_i32, %c0_i32_0 : i32, i32
  }
  func.func @transform_3(%arg0: i32) -> (i32, i32) {
    %c0_i32 = arith.constant 0 : i32
    %c0_i32_0 = arith.constant 0 : i32
    %c0_i32_1 = arith.constant 0 : i32
    return %c0_i32, %c0_i32_0 : i32, i32
  }
  func.func @transform_4(%arg0: i32) -> (i32, i32) {
    %c0_i32 = arith.constant 0 : i32
    %c0_i32_0 = arith.constant 0 : i32
    %c0_i32_1 = arith.constant 0 : i32
    return %c0_i32, %c0_i32_0 : i32, i32
  }
  func.func @transform_5(%arg0: i32) -> (i32, i32) {
    %c0_i32 = arith.constant 0 : i32
    %c0_i32_0 = arith.constant 0 : i32
    return %c0_i32, %arg0 : i32, i32
  }
}

</mosaic_0001>

<bundles_post_ra>
// kernel: tpu_custom_call.1
= control target key start
LH: loop header
LB: loop body
LE: loop exit
PB: predicated region body
PF: predicated region fallthrough
CT: control target
= control target key end

     0   :  { %vm668_vm0 = vcmask 1043456   ;;  %vm475_vm1 = vcmask 64512   ;;  %s4345_s0 = inlined_call_operand.vmem [shape: bf16[1024,8], index: 0, kind: input, shape index: {}]   ;;  %s4346_s1 = inlined_call_operand.vmem [shape: bf16[8,32], index: 1, kind: input, shape index: {}]   ;;  %s4347_s2 = inlined_call_operand.vmem [shape: f32[1,32], index: 2, kind: input, shape index: {}]   ;;  %s4348_s3 = inlined_call_operand.vmem [shape: bf16[32,128], index: 3, kind: input, shape index: {}]   ;;  %s4349_s4 = inlined_call_operand.vmem [shape: f32[1,128], index: 4, kind: input, shape index: {}]   ;;  %s4350_s5 = inlined_call_operand.hbm [shape: f32[128,128], index: 5, kind: output, shape index: {}]  }
   0x1   :  { %v150_v0 = vld [vmem:[%s4346_s1] sm:$0xf] }
   0x2   :  { %v670_v1 = vsel %vm668_vm0, %v150_v0, 0  ;;  %v3352_v2 = vld [vmem:[%s4345_s0] sm:$0xff] }
   0x3   :  { %679 = vmatpush.bf16.msra.mxu0 %v670_v1  ;;  %3418 = vmatpush.bf16.msra.mxu3 %v670_v1 }
   0x4   :  { %10 = vsyncpa [#allocation3], 0  ;;  %v3353_v3 = vld [vmem:[%s4345_s0 + $0x8] sm:$0xff]  ;;  %v3354_v4 = vld [vmem:[%s4345_s0 + $0x10] sm:$0xff]  ;;  %vm1213_vm2 = vcmask 261120   ;;  %vm2759_vm3 = vcmask 1041409  }
   0x5   :  { %v3355_v5 = vld [vmem:[%s4345_s0 + $0x18] sm:$0xff]  ;;  %v3356_v6 = vld [vmem:[%s4345_s0 + $0x20] sm:$0xff]  ;;  %v3357_v7 = vld [vmem:[%s4345_s0 + $0x28] sm:$0xff]  ;;  %vm2761_vm4 = vcmask 1042434   ;;  %vm2763_vm5 = vcmask 1043459   ;;  %vm2765_vm6 = vcmask 1044484  }
   0x6   :  { %3216 = vmatmul.msk.bf16.vlgmr.msra.gmra.mxu0 %vm475_vm1, %v3352_v2  ;;  %v3358_v8 = vld [vmem:[%s4345_s0 + $0x30] sm:$0xff]  ;;  %v3417_v9 = vld [vmem:[%s4348_s3 + $0x8] sm:$0xff]  ;;  %v3416_v10 = vld [vmem:[%s4348_s3] sm:$0xff]  ;;  %vm2767_vm7 = vcmask 1045509   ;;  %vm2769_vm8 = vcmask 1046534   ;;  %vm2771_vm9 = vcmask 1047559  }
   0x7   :  { %1412 = vmatpush.bf16.msra.mxu1 %v3417_v9  ;;  %3419 = vmatpush.bf16.msra.mxu2 %v3417_v9  ;;  %v3359_v11 = vld [vmem:[%s4345_s0 + $0x38] sm:$0xff]  ;;  %v3360_v12 = vld [vmem:[%s4345_s0 + $0x40] sm:$0xff]  ;;  %v3361_v21 = vld [vmem:[%s4345_s0 + $0x48] sm:$0xff]  ;;  %s2948_s8 = sshll.u32 %s4350_s5, 4  ;;  %s3459_s9 = smov 128   ;;  %s2949_s8 = int_to_ptr.hbm [resolvable:$true] %s2948_s8 }
   0x8   :  { %v3538_v14 = vld [vmem:[%s4347_s2] ss:$0 sm:$0xff]  ;;  %v3362_v29 = vld [vmem:[%s4345_s0 + $0x50] sm:$0xff]  ;;  %v3363_v37 = vld [vmem:[%s4345_s0 + $0x58] sm:$0xff]  ;;  %s3460_s10 = smov 8  }
   0x9   :  { %v3364_v45 = vld [vmem:[%s4345_s0 + $0x60] sm:$0xff]  ;;  %v3365_v53 = vld [vmem:[%s4345_s0 + $0x68] sm:$0xff]  ;;  %v3366_v61 = vld [vmem:[%s4345_s0 + $0x70] sm:$0xff] }
   0xb   :  { %1413 = vmatpush.bf16.msra.mxu1 %v3416_v10  ;;  %3420 = vmatpush.bf16.msra.mxu2 %v3416_v10 }
  0x16   :  { %3217 = vmatmul.msk.bf16.gmra.mxu0 %vm475_vm1, %v3353_v3 }
  0x26   :  { %3218 = vmatmul.msk.bf16.gmra.mxu0 %vm475_vm1, %v3354_v4 }
  0x36   :  { %3219 = vmatmul.msk.bf16.gmra.mxu0 %vm475_vm1, %v3355_v5  ;;  %v3367_v5 = vld [vmem:[%s4345_s0 + $0x78] sm:$0xff] }
  0x46   :  { %3220 = vmatmul.msk.bf16.gmra.mxu0 %vm475_vm1, %v3356_v6 }
  0x56   :  { %3221 = vmatmul.msk.bf16.gmra.mxu0 %vm475_vm1, %v3357_v7 }
  0x66   :  { %3222 = vmatmul.msk.bf16.gmra.mxu0 %vm475_vm1, %v3358_v8 }
  0x76   :  { %3223 = vmatmul.msk.bf16.gmra.mxu0 %vm475_vm1, %v3359_v11 }
  0x83   :  { %v681_v13 = vpop.f32.mrf.mxu0 }
  0x84   :  { %v682_v15 = vadd.f32 %v3538_v14, %v681_v13  ;;  %v3368_v13 = vld [vmem:[%s4345_s0 + $0x80] sm:$0xff] }
  0x86   :  { %3224 = vmatmul.msk.bf16.gmra.mxu0 %vm475_vm1, %v3360_v12  ;;  %v1001_v18 = vmax.f32 %v682_v15, 0.0 }
  0x8b   :  { %v683_v16 = vpop.f32.mrf.mxu0 }
  0x8c   :  { %v684_v17 = vadd.f32 %v3538_v14, %v683_v16 }
  0x8e   :  { %v1002_v19 = vmax.f32 %v684_v17, 0.0 }
  0x90   :  { %v1129_v20 = vpack.c.bf16 %v1002_v19, %v1001_v18 }
  0x92   :  { %3288 = vmatmul.msk.bf16.vlgmr.msra.gmra.mxu1 %vm1213_vm2, %v1129_v20 }
  0x93   :  { %v686_v22 = vpop.f32.mrf.mxu0 }
  0x94   :  { %v687_v23 = vadd.f32 %v3538_v14, %v686_v22 }
  0x96   :  { %3225 = vmatmul.msk.bf16.gmra.mxu0 %vm475_vm1, %v3361_v21  ;;  %v1003_v26 = vmax.f32 %v687_v23, 0.0  ;;  %v3369_v23 = vld [vmem:[%s4345_s0 + $0x88] sm:$0xff] }
  0x9b   :  { %v688_v24 = vpop.f32.mrf.mxu0 }
  0x9c   :  { %v689_v25 = vadd.f32 %v3538_v14, %v688_v24 }
  0x9e   :  { %v1004_v27 = vmax.f32 %v689_v25, 0.0 }
  0xa0   :  { %v1130_v28 = vpack.c.bf16 %v1004_v27, %v1003_v26 }
  0xa2   :  { %3289 = vmatmul.msk.bf16.gmra.mxu1 %vm1213_vm2, %v1130_v28 }
  0xa3   :  { %v691_v30 = vpop.f32.mrf.mxu0 }
  0xa4   :  { %v692_v31 = vadd.f32 %v3538_v14, %v691_v30 }
  0xa6   :  { %3226 = vmatmul.msk.bf16.gmra.mxu0 %vm475_vm1, %v3362_v29  ;;  %v1005_v34 = vmax.f32 %v692_v31, 0.0 }
  0xab   :  { %v693_v32 = vpop.f32.mrf.mxu0 }
  0xac   :  { %v694_v33 = vadd.f32 %v3538_v14, %v693_v32 }
  0xae   :  { %v1006_v35 = vmax.f32 %v694_v33, 0.0  ;;  %v3370_v33 = vld [vmem:[%s4345_s0 + $0x90] sm:$0xff] }
  0xb0   :  { %v1131_v36 = vpack.c.bf16 %v1006_v35, %v1005_v34 }
  0xb2   :  { %3290 = vmatmul.msk.bf16.gmra.mxu1 %vm1213_vm2, %v1131_v36 }
  0xb3   :  { %v696_v38 = vpop.f32.mrf.mxu0 }
  0xb4   :  { %v697_v39 = vadd.f32 %v3538_v14, %v696_v38 }
  0xb6   :  { %3227 = vmatmul.msk.bf16.gmra.mxu0 %vm475_vm1, %v3363_v37  ;;  %v1007_v42 = vmax.f32 %v697_v39, 0.0 }
  0xbb   :  { %v698_v40 = vpop.f32.mrf.mxu0 }
  0xbc   :  { %v699_v41 = vadd.f32 %v3538_v14, %v698_v40 }
  0xbe   :  { %v1008_v43 = vmax.f32 %v699_v41, 0.0  ;;  %v3616_v41 = vld [vmem:[%s4349_s4] ss:$0 sm:$0xff] }
  0xc0   :  { %v1132_v44 = vpack.c.bf16 %v1008_v43, %v1007_v42 }
  0xc2   :  { %3291 = vmatmul.msk.bf16.gmra.mxu1 %vm1213_vm2, %v1132_v44 }
  0xc3   :  { %v701_v46 = vpop.f32.mrf.mxu0 }
  0xc4   :  { %v702_v47 = vadd.f32 %v3538_v14, %v701_v46 }
  0xc6   :  { %3228 = vmatmul.msk.bf16.gmra.mxu0 %vm475_vm1, %v3364_v45  ;;  %v1009_v50 = vmax.f32 %v702_v47, 0.0  ;;  %v3371_v45 = vld [vmem:[%s4345_s0 + $0x98] sm:$0xff] }
  0xcb   :  { %v703_v48 = vpop.f32.mrf.mxu0 }
  0xcc   :  { %v704_v49 = vadd.f32 %v3538_v14, %v703_v48 }
  0xce   :  { %v1010_v51 = vmax.f32 %v704_v49, 0.0 }
  0xd0   :  { %v1133_v52 = vpack.c.bf16 %v1010_v51, %v1009_v50 }
  0xd2   :  { %3292 = vmatmul.msk.bf16.gmra.mxu1 %vm1213_vm2, %v1133_v52 }
  0xd3   :  { %v706_v54 = vpop.f32.mrf.mxu0 }
  0xd4   :  { %v707_v55 = vadd.f32 %v3538_v14, %v706_v54 }
  0xd6   :  { %3229 = vmatmul.msk.bf16.gmra.mxu0 %vm475_vm1, %v3365_v53  ;;  %v1011_v58 = vmax.f32 %v707_v55, 0.0 }
  0xdb   :  { %v708_v56 = vpop.f32.mrf.mxu0 }
  0xdc   :  { %v709_v57 = vadd.f32 %v3538_v14, %v708_v56 }
  0xde   :  { %v1012_v59 = vmax.f32 %v709_v57, 0.0 }
  0xe0   :  { %v1134_v60 = vpack.c.bf16 %v1012_v59, %v1011_v58 }
  0xe2   :  { %3293 = vmatmul.msk.bf16.gmra.mxu1 %vm1213_vm2, %v1134_v60 }
  0xe3   :  { %v711_v62 = vpop.f32.mrf.mxu0 }
  0xe4   :  { %v712_v63 = vadd.f32 %v3538_v14, %v711_v62 }
  0xe6   :  { %3230 = vmatmul.msk.bf16.gmra.mxu0 %vm475_vm1, %v3366_v61  ;;  %v1013_v2 = vmax.f32 %v712_v63, 0.0 }
  0xeb   :  { %v713_v0 = vpop.f32.mrf.mxu0 }
  0xec   :  { %v714_v1 = vadd.f32 %v3538_v14, %v713_v0 }
  0xee   :  { %v1014_v3 = vmax.f32 %v714_v1, 0.0 }
  0xf0   :  { %v1135_v4 = vpack.c.bf16 %v1014_v3, %v1013_v2 }
  0xf2   :  { %3294 = vmatmul.msk.bf16.gmra.mxu1 %vm1213_vm2, %v1135_v4 }
  0xf3   :  { %v716_v6 = vpop.f32.mrf.mxu0 }
  0xf4   :  { %v717_v7 = vadd.f32 %v3538_v14, %v716_v6 }
  0xf6   :  { %3231 = vmatmul.msk.bf16.gmra.mxu0 %vm475_vm1, %v3367_v5  ;;  %v1015_v10 = vmax.f32 %v717_v7, 0.0 }
  0xfb   :  { %v718_v8 = vpop.f32.mrf.mxu0 }
  0xfc   :  { %v719_v9 = vadd.f32 %v3538_v14, %v718_v8 }
  0xfe   :  { %v1016_v11 = vmax.f32 %v719_v9, 0.0 }
 0x100   :  { %v1136_v12 = vpack.c.bf16 %v1016_v11, %v1015_v10 }
 0x102   :  { %3295 = vmatmul.msk.bf16.gmra.mxu1 %vm1213_vm2, %v1136_v12 }
 0x103   :  { %v721_v15 = vpop.f32.mrf.mxu0 }
 0x104   :  { %v722_v16 = vadd.f32 %v3538_v14, %v721_v15 }
 0x106   :  { %3232 = vmatmul.msk.bf16.gmra.mxu0 %vm475_vm1, %v3368_v13  ;;  %v1017_v19 = vmax.f32 %v722_v16, 0.0 }
 0x10b   :  { %v723_v17 = vpop.f32.mrf.mxu0 }
 0x10c   :  { %v724_v18 = vadd.f32 %v3538_v14, %v723_v17 }
 0x10e   :  { %v1018_v20 = vmax.f32 %v724_v18, 0.0  ;;  %v3372_v18 = vld [vmem:[%s4345_s0 + $0xa0] sm:$0xff] }
 0x10f   :  { %v1415_v21 = vpop.f32.mrf.mxu1 }
 0x110   :  { %v1137_v22 = vpack.c.bf16 %v1018_v20, %v1017_v19  ;;  %v1416_v48 = vadd.f32 %v3616_v41, %v1415_v21 }
 0x112   :  { %3296 = vmatmul.msk.bf16.gmra.mxu1 %vm1213_vm2, %v1137_v22  ;;  %v1735_v54 = vmax.f32 %v1416_v48, 0.0 }
 0x113   :  { %v726_v24 = vpop.f32.mrf.mxu0 }
 0x114   :  { %v727_v26 = vadd.f32 %v3538_v14, %v726_v24  ;;  %v1863_v63 = vrot.slane %v1735_v54, 4 }
 0x116   :  { %3233 = vmatmul.msk.bf16.gmra.mxu0 %vm475_vm1, %v3369_v23  ;;  %v1019_v29 = vmax.f32 %v727_v26, 0.0  ;;  %v1864_v9 = vmax.f32 %v1735_v54, %v1863_v63  ;;  %v3373_v63 = vld [vmem:[%s4345_s0 + $0xa8] sm:$0xff] }
 0x117   :  { %v1417_v25 = vpop.f32.mrf.mxu1 }
 0x118   :  { %v1418_v44 = vadd.f32 %v3616_v41, %v1417_v25  ;;  %v1865_v21 = vrot.slane %v1864_v9, 2 }
 0x11a   :  { %v1736_v50 = vmax.f32 %v1418_v44, 0.0 }
 0x11b   :  { %v728_v27 = vpop.f32.mrf.mxu0 }
 0x11c   :  { %v729_v28 = vadd.f32 %v3538_v14, %v728_v27  ;;  %v1869_v57 = vrot.slane %v1736_v50, 4 }
 0x11e   :  { %v1020_v30 = vmax.f32 %v729_v28, 0.0  ;;  %v1870_v2 = vmax.f32 %v1736_v50, %v1869_v57 }
 0x11f   :  { %v1420_v31 = vpop.f32.mrf.mxu1 }
 0x120   :  { %v1138_v32 = vpack.c.bf16 %v1020_v30, %v1019_v29  ;;  %v1421_v46 = vadd.f32 %v3616_v41, %v1420_v31  ;;  %v1871_v13 = vrot.slane %v1870_v2, 2  ;;  %v1866_v30 = vmax.f32 %v1864_v9, %v1865_v21 }
 0x122   :  { %3297 = vmatmul.msk.bf16.gmra.mxu1 %vm1213_vm2, %v1138_v32  ;;  %v1737_v52 = vmax.f32 %v1421_v46, 0.0  ;;  %v1872_v24 = vmax.f32 %v1870_v2, %v1871_v13 }
 0x123   :  { %v731_v34 = vpop.f32.mrf.mxu0 }
 0x124   :  { %v732_v36 = vadd.f32 %v3538_v14, %v731_v34  ;;  %v1875_v61 = vrot.slane %v1737_v52, 4  ;;  %v1873_v34 = vrot.slane %v1872_v24, 1 }
 0x126   :  { %3234 = vmatmul.msk.bf16.gmra.mxu0 %vm475_vm1, %v3370_v33  ;;  %v1021_v39 = vmax.f32 %v732_v36, 0.0  ;;  %v1876_v7 = vmax.f32 %v1737_v52, %v1875_v61 }
 0x127   :  { %v1422_v35 = vpop.f32.mrf.mxu1 }
 0x128   :  { %v1423_v49 = vadd.f32 %v3616_v41, %v1422_v35  ;;  %v1877_v19 = vrot.slane %v1876_v7, 2 }
 0x12a   :  { %v1738_v55 = vmax.f32 %v1423_v49, 0.0  ;;  %v1878_v28 = vmax.f32 %v1876_v7, %v1877_v19 }
 0x12b   :  { %v733_v37 = vpop.f32.mrf.mxu0 }
 0x12c   :  { %v734_v38 = vadd.f32 %v3538_v14, %v733_v37  ;;  %v1881_v0 = vrot.slane %v1738_v55, 4 }
 0x12e   :  { %v1022_v40 = vmax.f32 %v734_v38, 0.0  ;;  %v1882_v10 = vmax.f32 %v1738_v55, %v1881_v0 }
 0x12f   :  { %v1425_v42 = vpop.f32.mrf.mxu1 }
 0x130   :  { %v1139_v43 = vpack.c.bf16 %v1022_v40, %v1021_v39  ;;  %v1426_v51 = vadd.f32 %v3616_v41, %v1425_v42  ;;  %v1883_v22 = vrot.slane %v1882_v10, 2  ;;  %v1879_v39 = vrot.slane %v1878_v28, 1 }
 0x132   :  { %3298 = vmatmul.msk.bf16.gmra.mxu1 %vm1213_vm2, %v1139_v43  ;;  %v1739_v58 = vmax.f32 %v1426_v51, 0.0  ;;  %v1884_v31 = vmax.f32 %v1882_v10, %v1883_v22  ;;  %v1867_v43 = vrot.slane %v1866_v30, 1 }
 0x133   :  { %v736_v47 = vpop.f32.mrf.mxu0 }
 0x134   :  { %v737_v59 = vadd.f32 %v3538_v14, %v736_v47  ;;  %v1887_v3 = vrot.slane %v1739_v58, 4  ;;  %v1885_v44 = vrot.slane %v1884_v31, 1  ;;  %v1874_v47 = vmax.f32 %v1872_v24, %v1873_v34 }
 0x136   :  { %3235 = vmatmul.msk.bf16.gmra.mxu0 %vm475_vm1, %v3371_v45  ;;  %v1023_v4 = vmax.f32 %v737_v59, 0.0  ;;  %v1888_v15 = vmax.f32 %v1739_v58, %v1887_v3  ;;  %v1886_v57 = vmax.f32 %v1884_v31, %v1885_v44  ;;  %v3375_v31 = vld [vmem:[%s4345_s0 + $0xb8] sm:$0xff] }
 0x137   :  { %v1427_v53 = vpop.f32.mrf.mxu1 }
 0x138   :  { %v1428_v56 = vadd.f32 %v3616_v41, %v1427_v53  ;;  %v1889_v25 = vrot.slane %v1888_v15, 2  ;;  %v1880_v53 = vmax.f32 %v1878_v28, %v1879_v39 }
 0x13a   :  { %v1740_v60 = vmax.f32 %v1428_v56, 0.0  ;;  %v1890_v35 = vmax.f32 %v1888_v15, %v1889_v25  ;;  %v1868_v56 = vmax.f32 %v1866_v30, %v1867_v43 }
 0x13b   :  { %v738_v62 = vpop.f32.mrf.mxu0 }
 0x13c   :  { %v739_v1 = vadd.f32 %v3538_v14, %v738_v62  ;;  %v1893_v5 = vrot.slane %v1740_v60, 4  ;;  %v1891_v48 = vrot.slane %v1890_v35, 1  ;;  %v2760_v61 = vsel %vm2759_vm3, %v1874_v47, %v1868_v56 }
 0x13d   :  { %v2762_v3 = vsel %vm2761_vm4, %v1880_v53, %v2760_v61 }
 0x13e   :  { %v1024_v6 = vmax.f32 %v739_v1, 0.0  ;;  %v1894_v16 = vmax.f32 %v1740_v60, %v1893_v5  ;;  %v1892_v60 = vmax.f32 %v1890_v35, %v1891_v48  ;;  %v2764_v5 = vsel %vm2763_vm5, %v1886_v57, %v2762_v3 }
 0x13f   :  { %v1430_v8 = vpop.f32.mrf.mxu1 }
 0x140   :  { %v1431_v11 = vadd.f32 %v3616_v41, %v1430_v8  ;;  %v1140_v12 = vpack.c.bf16 %v1024_v6, %v1023_v4  ;;  %v1895_v26 = vrot.slane %v1894_v16, 2  ;;  %v2766_v6 = vsel %vm2765_vm6, %v1892_v60, %v2764_v5 }
 0x142   :  { %v1741_v17 = vmax.f32 %v1431_v11, 0.0  ;;  %3299 = vmatmul.msk.bf16.gmra.mxu1 %vm1213_vm2, %v1140_v12  ;;  %v1896_v36 = vmax.f32 %v1894_v16, %v1895_v26 }
 0x143   :  { %v741_v20 = vpop.f32.mrf.mxu0 }
 0x144   :  { %v1899_v23 = vrot.slane %v1741_v17, 4  ;;  %v742_v37 = vadd.f32 %v3538_v14, %v741_v20  ;;  %v1897_v49 = vrot.slane %v1896_v36, 1  ;;  %v3374_v20 = vld [vmem:[%s4345_s0 + $0xb0] sm:$0xff] }
 0x146   :  { %v1900_v27 = vmax.f32 %v1741_v17, %v1899_v23  ;;  %3236 = vmatmul.msk.bf16.gmra.mxu0 %vm475_vm1, %v3372_v18  ;;  %v1025_v50 = vmax.f32 %v742_v37, 0.0  ;;  %v1898_v62 = vmax.f32 %v1896_v36, %v1897_v49 }
 0x147   :  { %v1432_v29 = vpop.f32.mrf.mxu1 }
 0x148   :  { %v1901_v32 = vrot.slane %v1900_v27, 2  ;;  %v1433_v33 = vadd.f32 %v3616_v41, %v1432_v29  ;;  %v2768_v8 = vsel %vm2767_vm7, %v1898_v62, %v2766_v6 }
 0x14a   :  { %v1742_v38 = vmax.f32 %v1433_v33, 0.0  ;;  %v1902_v40 = vmax.f32 %v1900_v27, %v1901_v32 }
 0x14b   :  { %v743_v42 = vpop.f32.mrf.mxu0 }
 0x14c   :  { %v1905_v45 = vrot.slane %v1742_v38, 4  ;;  %v744_v46 = vadd.f32 %v3538_v14, %v743_v42  ;;  %v1903_v54 = vrot.slane %v1902_v40, 1 }
 0x14e   :  { %v1906_v51 = vmax.f32 %v1742_v38, %v1905_v45  ;;  %v1026_v52 = vmax.f32 %v744_v46, 0.0  ;;  %v1904_v2 = vmax.f32 %v1902_v40, %v1903_v54 }
 0x14f   :  { %v1435_v55 = vpop.f32.mrf.mxu1 }
 0x150   :  { %v1907_v58 = vrot.slane %v1906_v51, 2  ;;  %v1141_v59 = vpack.c.bf16 %v1026_v52, %v1025_v50  ;;  %v2770_v10 = vsel %vm2769_vm8, %v1904_v2, %v2768_v8  ;;  %v1436_v34 = vadd.f32 %v3616_v41, %v1435_v55 }
 0x152   :  { %3300 = vmatmul.msk.bf16.gmra.mxu1 %vm1213_vm2, %v1141_v59  ;;  %v1908_v0 = vmax.f32 %v1906_v51, %v1907_v58  ;;  %v1743_v40 = vmax.f32 %v1436_v34, 0.0 }
 0x153   :  { %v746_v1 = vpop.f32.mrf.mxu0 }
 0x154   :  { %v1909_v4 = vrot.slane %v1908_v0, 1  ;;  %v747_v12 = vadd.f32 %v3538_v14, %v746_v1  ;;  %v1911_v50 = vrot.slane %v1743_v40, 4 }
 0x156   :  { %3237 = vmatmul.msk.bf16.gmra.mxu0 %vm475_vm1, %v3373_v63  ;;  %v1910_v7 = vmax.f32 %v1908_v0, %v1909_v4  ;;  %v1027_v16 = vmax.f32 %v747_v12, 0.0  ;;  %v1912_v60 = vmax.f32 %v1743_v40, %v1911_v50  ;;  %v3376_v4 = vld [vmem:[%s4345_s0 + $0xc0] sm:$0xff] }
 0x157   :  { %v1437_v9 = vpop.f32.mrf.mxu1 }
 0x158   :  { %v2772_v11 = vsel %vm2771_vm9, %v1910_v7, %v2770_v10  ;;  %v1438_v30 = vadd.f32 %v3616_v41, %v1437_v9  ;;  %v1913_v7 = vrot.slane %v1912_v60, 2 }
 0x159   :  { %2894 = vxpose.xlu0.b32.start [1/16] %v2772_v11, 128 }
 0x15a   :  { %v1744_v36 = vmax.f32 %v1438_v30, 0.0 }
 0x15b   :  { %v748_v13 = vpop.f32.mrf.mxu0 }
 0x15c   :  { %v749_v15 = vadd.f32 %v3538_v14, %v748_v13  ;;  %v1917_v44 = vrot.slane %v1744_v36, 4 }
 0x15e   :  { %v1028_v17 = vmax.f32 %v749_v15, 0.0  ;;  %v1918_v53 = vmax.f32 %v1744_v36, %v1917_v44 }
 0x15f   :  { %v1440_v18 = vpop.f32.mrf.mxu1 }
 0x160   :  { %v1142_v19 = vpack.c.bf16 %v1028_v17, %v1027_v16  ;;  %v1441_v32 = vadd.f32 %v3616_v41, %v1440_v18  ;;  %v1919_v0 = vrot.slane %v1918_v53, 2  ;;  %v1914_v17 = vmax.f32 %v1912_v60, %v1913_v7 }
 0x162   :  { %3301 = vmatmul.msk.bf16.gmra.mxu1 %vm1213_vm2, %v1142_v19  ;;  %v1745_v38 = vmax.f32 %v1441_v32, 0.0  ;;  %v1920_v10 = vmax.f32 %v1918_v53, %v1919_v0 }
 0x163   :  { %v751_v21 = vpop.f32.mrf.mxu0 }
 0x164   :  { %v752_v23 = vadd.f32 %v3538_v14, %v751_v21  ;;  %v1923_v48 = vrot.slane %v1745_v38, 4  ;;  %v1921_v21 = vrot.slane %v1920_v10, 1 }
 0x166   :  { %3238 = vmatmul.msk.bf16.gmra.mxu0 %vm475_vm1, %v3374_v20  ;;  %v1029_v26 = vmax.f32 %v752_v23, 0.0  ;;  %v1924_v58 = vmax.f32 %v1745_v38, %v1923_v48 }
 0x167   :  { %v1442_v22 = vpop.f32.mrf.mxu1 }
 0x168   :  { %v1443_v35 = vadd.f32 %v3616_v41, %v1442_v22  ;;  %v1925_v5 = vrot.slane %v1924_v58, 2 }
 0x16a   :  { %v1746_v42 = vmax.f32 %v1443_v35, 0.0  ;;  %v1926_v15 = vmax.f32 %v1924_v58, %v1925_v5 }
 0x16b   :  { %v753_v24 = vpop.f32.mrf.mxu0 }
 0x16c   :  { %v754_v25 = vadd.f32 %v3538_v14, %v753_v24  ;;  %v1929_v51 = vrot.slane %v1746_v42, 4 }
 0x16e   :  { %v1030_v27 = vmax.f32 %v754_v25, 0.0  ;;  %v1930_v61 = vmax.f32 %v1746_v42, %v1929_v51  ;;  %v3377_v51 = vld [vmem:[%s4345_s0 + $0xc8] sm:$0xff] }
 0x16f   :  { %v1445_v28 = vpop.f32.mrf.mxu1 }
 0x170   :  { %v1143_v29 = vpack.c.bf16 %v1030_v27, %v1029_v26  ;;  %v1446_v37 = vadd.f32 %v3616_v41, %v1445_v28  ;;  %v1931_v8 = vrot.slane %v1930_v61, 2  ;;  %v1927_v26 = vrot.slane %v1926_v15, 1 }
 0x172   :  { %3302 = vmatmul.msk.bf16.gmra.mxu1 %vm1213_vm2, %v1143_v29  ;;  %v1747_v45 = vmax.f32 %v1446_v37, 0.0  ;;  %v1932_v18 = vmax.f32 %v1930_v61, %v1931_v8  ;;  %v1915_v29 = vrot.slane %v1914_v17, 1 }
 0x173   :  { %v756_v33 = vpop.f32.mrf.mxu0 }
 0x174   :  { %v757_v46 = vadd.f32 %v3538_v14, %v756_v33  ;;  %v1935_v54 = vrot.slane %v1747_v45, 4  ;;  %v1933_v30 = vrot.slane %v1932_v18, 1  ;;  %v1922_v33 = vmax.f32 %v1920_v10, %v1921_v21 }
 0x176   :  { %3239 = vmatmul.msk.bf16.gmra.mxu0 %vm475_vm1, %v3375_v31  ;;  %v1031_v55 = vmax.f32 %v757_v46, 0.0  ;;  %v1936_v1 = vmax.f32 %v1747_v45, %v1935_v54  ;;  %v1934_v44 = vmax.f32 %v1932_v18, %v1933_v30  ;;  %v3379_v18 = vld [vmem:[%s4345_s0 + $0xd8] sm:$0xff] }
 0x177   :  { %v1447_v39 = vpop.f32.mrf.mxu1 }
 0x178   :  { %v1448_v43 = vadd.f32 %v3616_v41, %v1447_v39  ;;  %v1937_v11 = vrot.slane %v1936_v1, 2  ;;  %v1928_v39 = vmax.f32 %v1926_v15, %v1927_v26 }
 0x17a   :  { %v1748_v47 = vmax.f32 %v1448_v43, 0.0  ;;  %v1938_v22 = vmax.f32 %v1936_v1, %v1937_v11  ;;  %v1916_v43 = vmax.f32 %v1914_v17, %v1915_v29 }
 0x17b   :  { %v758_v49 = vpop.f32.mrf.mxu0 }
 0x17c   :  { %v759_v52 = vadd.f32 %v3538_v14, %v758_v49  ;;  %v1941_v56 = vrot.slane %v1748_v47, 4  ;;  %v1939_v34 = vrot.slane %v1938_v22, 1  ;;  %v2773_v48 = vsel %vm2759_vm3, %v1922_v33, %v1916_v43 }
 0x17e   :  { %v1032_v57 = vmax.f32 %v759_v52, 0.0  ;;  %v1942_v2 = vmax.f32 %v1748_v47, %v1941_v56  ;;  %v1940_v47 = vmax.f32 %v1938_v22, %v1939_v34  ;;  %v2774_v52 = vsel %vm2761_vm4, %v1928_v39, %v2773_v48 }
 0x17f   :  { %v1450_v59 = vpop.f32.mrf.mxu1  ;;  %v2775_v56 = vsel %vm2763_vm5, %v1934_v44, %v2774_v52 }
 0x180   :  { %v1144_v62 = vpack.c.bf16 %v1032_v57, %v1031_v55  ;;  %v1451_v63 = vadd.f32 %v3616_v41, %v1450_v59  ;;  %v1943_v12 = vrot.slane %v1942_v2, 2  ;;  %v2776_v57 = vsel %vm2765_vm6, %v1940_v47, %v2775_v56 }
 0x182   :  { %v1749_v3 = vmax.f32 %v1451_v63, 0.0  ;;  %3303 = vmatmul.msk.bf16.gmra.mxu1 %vm1213_vm2, %v1144_v62  ;;  %v1944_v23 = vmax.f32 %v1942_v2, %v1943_v12 }
 0x183   :  { %v761_v6 = vpop.f32.mrf.mxu0 }
 0x184   :  { %v1947_v9 = vrot.slane %v1749_v3, 4  ;;  %v762_v24 = vadd.f32 %v3538_v14, %v761_v6  ;;  %v1945_v35 = vrot.slane %v1944_v23, 1  ;;  %v3378_v6 = vld [vmem:[%s4345_s0 + $0xd0] sm:$0xff] }
 0x186   :  { %v1948_v13 = vmax.f32 %v1749_v3, %v1947_v9  ;;  %3240 = vmatmul.msk.bf16.gmra.mxu0 %vm475_vm1, %v3376_v4  ;;  %v1033_v36 = vmax.f32 %v762_v24, 0.0  ;;  %v1946_v49 = vmax.f32 %v1944_v23, %v1945_v35 }
 0x187   :  { %v1452_v16 = vpop.f32.mrf.mxu1 }
 0x188   :  { %v1949_v19 = vrot.slane %v1948_v13, 2  ;;  %v1453_v20 = vadd.f32 %v3616_v41, %v1452_v16  ;;  %v2777_v59 = vsel %vm2767_vm7, %v1946_v49, %v2776_v57 }
 0x18a   :  { %v1750_v25 = vmax.f32 %v1453_v20, 0.0  ;;  %v1950_v27 = vmax.f32 %v1948_v13, %v1949_v19 }
 0x18b   :  { %v763_v28 = vpop.f32.mrf.mxu0 }
 0x18c   :  { %v1953_v31 = vrot.slane %v1750_v25, 4  ;;  %v764_v32 = vadd.f32 %v3538_v14, %v763_v28  ;;  %v1951_v40 = vrot.slane %v1950_v27, 1 }
 0x18e   :  { %v1954_v37 = vmax.f32 %v1750_v25, %v1953_v31  ;;  %v1034_v38 = vmax.f32 %v764_v32, 0.0  ;;  %v1952_v53 = vmax.f32 %v1950_v27, %v1951_v40 }
 0x18f   :  { %v1455_v42 = vpop.f32.mrf.mxu1 }
 0x190   :  { %v1955_v45 = vrot.slane %v1954_v37, 2  ;;  %v1145_v46 = vpack.c.bf16 %v1034_v38, %v1033_v36  ;;  %v2778_v61 = vsel %vm2769_vm8, %v1952_v53, %v2777_v59  ;;  %v1456_v21 = vadd.f32 %v3616_v41, %v1455_v42 }
 0x192   :  { %v1956_v50 = vmax.f32 %v1954_v37, %v1955_v45  ;;  %3304 = vmatmul.msk.bf16.gmra.mxu1 %vm1213_vm2, %v1145_v46  ;;  %v1751_v27 = vmax.f32 %v1456_v21, 0.0 }
 0x193   :  { %v766_v54 = vpop.f32.mrf.mxu0 }
 0x194   :  { %v1957_v55 = vrot.slane %v1956_v50, 1  ;;  %v767_v63 = vadd.f32 %v3538_v14, %v766_v54  ;;  %v1959_v36 = vrot.slane %v1751_v27, 4 }
 0x196   :  { %3241 = vmatmul.msk.bf16.gmra.mxu0 %vm475_vm1, %v3377_v51  ;;  %v1958_v58 = vmax.f32 %v1956_v50, %v1957_v55  ;;  %v1035_v2 = vmax.f32 %v767_v63, 0.0  ;;  %v1960_v47 = vmax.f32 %v1751_v27, %v1959_v36  ;;  %v3380_v55 = vld [vmem:[%s4345_s0 + $0xe0] sm:$0xff] }
 0x197   :  { %v1457_v60 = vpop.f32.mrf.mxu1 }
 0x198   :  { %v2779_v62 = vsel %vm2771_vm9, %v1958_v58, %v2778_v61  ;;  %v1458_v17 = vadd.f32 %v3616_v41, %v1457_v60  ;;  %v1961_v58 = vrot.slane %v1960_v47, 2 }
 0x199   :  { %2895 = vxpose.xlu0.b32.cont [2/16] %v2779_v62, 128 }
 0x19a   :  { %v1752_v23 = vmax.f32 %v1458_v17, 0.0 }
 0x19b   :  { %v768_v0 = vpop.f32.mrf.mxu0 }
 0x19c   :  { %v769_v1 = vadd.f32 %v3538_v14, %v768_v0  ;;  %v1965_v30 = vrot.slane %v1752_v23, 4 }
 0x19e   :  { %v1036_v3 = vmax.f32 %v769_v1, 0.0  ;;  %v1966_v39 = vmax.f32 %v1752_v23, %v1965_v30 }
 0x19f   :  { %v1460_v4 = vpop.f32.mrf.mxu1 }
 0x1a0   :  { %v1146_v5 = vpack.c.bf16 %v1036_v3, %v1035_v2  ;;  %v1461_v19 = vadd.f32 %v3616_v41, %v1460_v4  ;;  %v1967_v51 = vrot.slane %v1966_v39, 2  ;;  %v1962_v3 = vmax.f32 %v1960_v47, %v1961_v58 }
 0x1a2   :  { %3305 = vmatmul.msk.bf16.gmra.mxu1 %vm1213_vm2, %v1146_v5  ;;  %v1753_v25 = vmax.f32 %v1461_v19, 0.0  ;;  %v1968_v61 = vmax.f32 %v1966_v39, %v1967_v51 }
 0x1a3   :  { %v771_v7 = vpop.f32.mrf.mxu0 }
 0x1a4   :  { %v772_v9 = vadd.f32 %v3538_v14, %v771_v7  ;;  %v1971_v34 = vrot.slane %v1753_v25, 4  ;;  %v1969_v7 = vrot.slane %v1968_v61, 1 }
 0x1a6   :  { %3242 = vmatmul.msk.bf16.gmra.mxu0 %vm475_vm1, %v3378_v6  ;;  %v1037_v12 = vmax.f32 %v772_v9, 0.0  ;;  %v1972_v45 = vmax.f32 %v1753_v25, %v1971_v34 }
 0x1a7   :  { %v1462_v8 = vpop.f32.mrf.mxu1 }
 0x1a8   :  { %v1463_v22 = vadd.f32 %v3616_v41, %v1462_v8  ;;  %v1973_v56 = vrot.slane %v1972_v45, 2 }
 0x1aa   :  { %v1754_v28 = vmax.f32 %v1463_v22, 0.0  ;;  %v1974_v1 = vmax.f32 %v1972_v45, %v1973_v56 }
 0x1ab   :  { %v773_v10 = vpop.f32.mrf.mxu0 }
 0x1ac   :  { %v774_v11 = vadd.f32 %v3538_v14, %v773_v10  ;;  %v1977_v37 = vrot.slane %v1754_v28, 4 }
 0x1ae   :  { %v1038_v13 = vmax.f32 %v774_v11, 0.0  ;;  %v1978_v48 = vmax.f32 %v1754_v28, %v1977_v37  ;;  %v3381_v37 = vld [vmem:[%s4345_s0 + $0xe8] sm:$0xff] }
 0x1af   :  { %v1465_v15 = vpop.f32.mrf.mxu1 }
 0x1b0   :  { %v1147_v16 = vpack.c.bf16 %v1038_v13, %v1037_v12  ;;  %v1466_v24 = vadd.f32 %v3616_v41, %v1465_v15  ;;  %v1979_v59 = vrot.slane %v1978_v48, 2  ;;  %v1975_v12 = vrot.slane %v1974_v1, 1 }
 0x1b2   :  { %3306 = vmatmul.msk.bf16.gmra.mxu1 %vm1213_vm2, %v1147_v16  ;;  %v1755_v31 = vmax.f32 %v1466_v24, 0.0  ;;  %v1980_v4 = vmax.f32 %v1978_v48, %v1979_v59  ;;  %v1963_v16 = vrot.slane %v1962_v3, 1  ;;  %v3385_v59 = vld [vmem:[%s4345_s0 + $0x108] sm:$0xff] }
 0x1b3   :  { %v776_v20 = vpop.f32.mrf.mxu0  ;;  %3249 = vmatmul.msk.bf16.vlgmr.msra.gmra.mxu3 %vm475_vm1, %v3385_v59 }
 0x1b4   :  { %v777_v32 = vadd.f32 %v3538_v14, %v776_v20  ;;  %v1983_v40 = vrot.slane %v1755_v31, 4  ;;  %v1981_v17 = vrot.slane %v1980_v4, 1  ;;  %v1970_v20 = vmax.f32 %v1968_v61, %v1969_v7 }
 0x1b6   :  { %3243 = vmatmul.msk.bf16.gmra.mxu0 %vm475_vm1, %v3379_v18  ;;  %v1039_v42 = vmax.f32 %v777_v32, 0.0  ;;  %v1984_v52 = vmax.f32 %v1755_v31, %v1983_v40  ;;  %v1982_v30 = vmax.f32 %v1980_v4, %v1981_v17 }
 0x1b7   :  { %v1467_v26 = vpop.f32.mrf.mxu1 }
 0x1b8   :  { %v1468_v29 = vadd.f32 %v3616_v41, %v1467_v26  ;;  %v1985_v62 = vrot.slane %v1984_v52, 2  ;;  %v1976_v26 = vmax.f32 %v1974_v1, %v1975_v12  ;;  %v3386_v12 = vld [vmem:[%s4345_s0 + $0x110] sm:$0xff] }
 0x1ba   :  { %v1756_v33 = vmax.f32 %v1468_v29, 0.0  ;;  %v1986_v8 = vmax.f32 %v1984_v52, %v1985_v62  ;;  %v1964_v29 = vmax.f32 %v1962_v3, %v1963_v16 }
 0x1bb   :  { %v778_v35 = vpop.f32.mrf.mxu0 }
 0x1bc   :  { %v779_v38 = vadd.f32 %v3538_v14, %v778_v35  ;;  %v1989_v43 = vrot.slane %v1756_v33, 4  ;;  %v1987_v21 = vrot.slane %v1986_v8, 1  ;;  %v2780_v34 = vsel %vm2759_vm3, %v1970_v20, %v1964_v29 }
 0x1be   :  { %v1040_v44 = vmax.f32 %v779_v38, 0.0  ;;  %v1990_v53 = vmax.f32 %v1756_v33, %v1989_v43  ;;  %v1988_v33 = vmax.f32 %v1986_v8, %v1987_v21  ;;  %v2781_v38 = vsel %vm2761_vm4, %v1976_v26, %v2780_v34 }
 0x1bf   :  { %v1470_v46 = vpop.f32.mrf.mxu1  ;;  %v2782_v43 = vsel %vm2763_vm5, %v1982_v30, %v2781_v38 }
 0x1c0   :  { %v1148_v49 = vpack.c.bf16 %v1040_v44, %v1039_v42  ;;  %v1471_v50 = vadd.f32 %v3616_v41, %v1470_v46  ;;  %v1991_v63 = vrot.slane %v1990_v53, 2  ;;  %v2783_v44 = vsel %vm2765_vm6, %v1988_v33, %v2782_v43 }
 0x1c2   :  { %v1757_v54 = vmax.f32 %v1471_v50, 0.0  ;;  %3307 = vmatmul.msk.bf16.gmra.mxu1 %vm1213_vm2, %v1148_v49  ;;  %v1992_v9 = vmax.f32 %v1990_v53, %v1991_v63 }
 0x1c3   :  { %v781_v57 = vpop.f32.mrf.mxu0  ;;  %3250 = vmatmul.msk.bf16.gmra.mxu3 %vm475_vm1, %v3386_v12 }
 0x1c4   :  { %v1995_v60 = vrot.slane %v1757_v54, 4  ;;  %v782_v10 = vadd.f32 %v3538_v14, %v781_v57  ;;  %v1993_v22 = vrot.slane %v1992_v9, 1  ;;  %v3382_v57 = vld [vmem:[%s4345_s0 + $0xf0] sm:$0xff] }
 0x1c6   :  { %v1996_v0 = vmax.f32 %v1757_v54, %v1995_v60  ;;  %3244 = vmatmul.msk.bf16.gmra.mxu0 %vm475_vm1, %v3380_v55  ;;  %v1041_v23 = vmax.f32 %v782_v10, 0.0  ;;  %v1994_v35 = vmax.f32 %v1992_v9, %v1993_v22 }
 0x1c7   :  { %v1472_v2 = vpop.f32.mrf.mxu1 }
 0x1c8   :  { %v1997_v5 = vrot.slane %v1996_v0, 2  ;;  %v1473_v6 = vadd.f32 %v3616_v41, %v1472_v2  ;;  %v2784_v46 = vsel %vm2767_vm7, %v1994_v35, %v2783_v44 }
 0x1ca   :  { %v1758_v11 = vmax.f32 %v1473_v6, 0.0  ;;  %v1998_v13 = vmax.f32 %v1996_v0, %v1997_v5  ;;  %v3383_v5 = vld [vmem:[%s4345_s0 + $0xf8] sm:$0xff] }
 0x1cb   :  { %v783_v15 = vpop.f32.mrf.mxu0 }
 0x1cc   :  { %v2001_v18 = vrot.slane %v1758_v11, 4  ;;  %v784_v19 = vadd.f32 %v3538_v14, %v783_v15  ;;  %v1999_v27 = vrot.slane %v1998_v13, 1 }
 0x1ce   :  { %v2002_v24 = vmax.f32 %v1758_v11, %v2001_v18  ;;  %v1042_v25 = vmax.f32 %v784_v19, 0.0  ;;  %v2000_v39 = vmax.f32 %v1998_v13, %v1999_v27 }
 0x1cf   :  { %v1475_v28 = vpop.f32.mrf.mxu1 }
 0x1d0   :  { %v2003_v31 = vrot.slane %v2002_v24, 2  ;;  %v1149_v32 = vpack.c.bf16 %v1042_v25, %v1041_v23  ;;  %v2785_v48 = vsel %vm2769_vm8, %v2000_v39, %v2784_v46  ;;  %v1476_v8 = vadd.f32 %v3616_v41, %v1475_v28 }
 0x1d2   :  { %v2004_v36 = vmax.f32 %v2002_v24, %v2003_v31  ;;  %3308 = vmatmul.msk.bf16.gmra.mxu1 %vm1213_vm2, %v1149_v32  ;;  %v1759_v16 = vmax.f32 %v1476_v8, 0.0 }
 0x1d3   :  { %v786_v40 = vpop.f32.mrf.mxu0 }
 0x1d4   :  { %v2005_v42 = vrot.slane %v2004_v36, 1  ;;  %v787_v50 = vadd.f32 %v3538_v14, %v786_v40  ;;  %v2007_v25 = vrot.slane %v1759_v16, 4 }
 0x1d6   :  { %3245 = vmatmul.msk.bf16.gmra.mxu0 %vm475_vm1, %v3381_v37  ;;  %v2006_v45 = vmax.f32 %v2004_v36, %v2005_v42  ;;  %v1043_v53 = vmax.f32 %v787_v50, 0.0  ;;  %v2008_v35 = vmax.f32 %v1759_v16, %v2007_v25 }
 0x1d7   :  { %v1477_v47 = vpop.f32.mrf.mxu1 }
 0x1d8   :  { %v2786_v49 = vsel %vm2771_vm9, %v2006_v45, %v2785_v48  ;;  %v1478_v4 = vadd.f32 %v3616_v41, %v1477_v47  ;;  %v2009_v46 = vrot.slane %v2008_v35, 2 }
 0x1d9   :  { %2896 = vxpose.xlu0.b32.cont [3/16] %v2786_v49, 128 }
 0x1da   :  { %v1760_v10 = vmax.f32 %v1478_v4, 0.0 }
 0x1db   :  { %v788_v51 = vpop.f32.mrf.mxu0 }
 0x1dc   :  { %v789_v52 = vadd.f32 %v3538_v14, %v788_v51  ;;  %v2013_v19 = vrot.slane %v1760_v10, 4 }
 0x1de   :  { %v1044_v54 = vmax.f32 %v789_v52, 0.0  ;;  %v2014_v28 = vmax.f32 %v1760_v10, %v2013_v19 }
 0x1df   :  { %v1480_v55 = vpop.f32.mrf.mxu1 }
 0x1e0   :  { %v1150_v56 = vpack.c.bf16 %v1044_v54, %v1043_v53  ;;  %v1481_v6 = vadd.f32 %v3616_v41, %v1480_v55  ;;  %v2015_v39 = vrot.slane %v2014_v28, 2  ;;  %v3387_v53 = vld [vmem:[%s4345_s0 + $0x118] sm:$0xff] }
 0x1e1   :  { %3251 = vmatmul.msk.bf16.gmra.mxu3 %vm475_vm1, %v3387_v53 }
 0x1e2   :  { %3309 = vmatmul.msk.bf16.gmra.mxu1 %vm1213_vm2, %v1150_v56  ;;  %v1761_v13 = vmax.f32 %v1481_v6, 0.0  ;;  %v2016_v49 = vmax.f32 %v2014_v28, %v2015_v39  ;;  %v2010_v56 = vmax.f32 %v2008_v35, %v2009_v46  ;;  %v3388_v35 = vld [vmem:[%s4345_s0 + $0x120] sm:$0xff] }
 0x1e3   :  { %v791_v58 = vpop.f32.mrf.mxu0 }
 0x1e4   :  { %v792_v61 = vadd.f32 %v3538_v14, %v791_v58  ;;  %v2019_v23 = vrot.slane %v1761_v13, 4 }
 0x1e6   :  { %3246 = vmatmul.msk.bf16.gmra.mxu0 %vm475_vm1, %v3382_v57  ;;  %v1045_v0 = vmax.f32 %v792_v61, 0.0  ;;  %v2020_v33 = vmax.f32 %v1761_v13, %v2019_v23 }
 0x1e7   :  { %v1482_v60 = vpop.f32.mrf.mxu1 }
 0x1e8   :  { %v1483_v9 = vadd.f32 %v3616_v41, %v1482_v60  ;;  %v2021_v44 = vrot.slane %v2020_v33, 2  ;;  %v2017_v60 = vrot.slane %v2016_v49, 1 }
 0x1ea   :  { %v1762_v17 = vmax.f32 %v1483_v9, 0.0  ;;  %v2022_v54 = vmax.f32 %v2020_v33, %v2021_v44  ;;  %v2018_v9 = vmax.f32 %v2016_v49, %v2017_v60 }
 0x1eb   :  { %v793_v62 = vpop.f32.mrf.mxu0 }
 0x1ec   :  { %v794_v63 = vadd.f32 %v3538_v14, %v793_v62  ;;  %v2025_v26 = vrot.slane %v1762_v17, 4 }
 0x1ee   :  { %v1046_v1 = vmax.f32 %v794_v63, 0.0  ;;  %v2026_v36 = vmax.f32 %v1762_v17, %v2025_v26  ;;  %v3782_v63 = vld [vmem:[%s4347_s2] ss:$0 sm:$0xff] }
 0x1ef   :  { %v1485_v2 = vpop.f32.mrf.mxu1 }
 0x1f0   :  { %v1151_v3 = vpack.c.bf16 %v1046_v1, %v1045_v0  ;;  %v1486_v11 = vadd.f32 %v3616_v41, %v1485_v2  ;;  %v2027_v47 = vrot.slane %v2026_v36, 2  ;;  %v2023_v2 = vrot.slane %v2022_v54, 1 }
 0x1f1   :  { %3252 = vmatmul.msk.bf16.gmra.mxu3 %vm475_vm1, %v3388_v35 }
 0x1f2   :  { %3310 = vmatmul.msk.bf16.gmra.mxu1 %vm1213_vm2, %v1151_v3  ;;  %v1763_v20 = vmax.f32 %v1486_v11, 0.0  ;;  %v2028_v57 = vmax.f32 %v2026_v36, %v2027_v47  ;;  %v2024_v16 = vmax.f32 %v2022_v54, %v2023_v2  ;;  %v3389_v47 = vld [vmem:[%s4345_s0 + $0x128] sm:$0xff] }
 0x1f3   :  { %v796_v7 = vpop.f32.mrf.mxu0 }
 0x1f4   :  { %v797_v21 = vadd.f32 %v3538_v14, %v796_v7  ;;  %v2031_v29 = vrot.slane %v1763_v20, 4  ;;  %v2029_v6 = vrot.slane %v2028_v57, 1 }
 0x1f6   :  { %3247 = vmatmul.msk.bf16.gmra.mxu0 %vm475_vm1, %v3383_v5  ;;  %v1047_v30 = vmax.f32 %v797_v21, 0.0  ;;  %v2032_v40 = vmax.f32 %v1763_v20, %v2031_v29  ;;  %v2011_v5 = vrot.slane %v2010_v56, 1  ;;  %v2030_v20 = vmax.f32 %v2028_v57, %v2029_v6 }
 0x1f7   :  { %v1487_v15 = vpop.f32.mrf.mxu1 }
 0x1f8   :  { %v1488_v18 = vadd.f32 %v3616_v41, %v1487_v15  ;;  %v2033_v50 = vrot.slane %v2032_v40, 2  ;;  %v2012_v19 = vmax.f32 %v2010_v56, %v2011_v5 }
 0x1fa   :  { %v1764_v22 = vmax.f32 %v1488_v18, 0.0  ;;  %v2034_v61 = vmax.f32 %v2032_v40, %v2033_v50 }
 0x1fb   :  { %v798_v24 = vpop.f32.mrf.mxu0 }
 0x1fc   :  { %v799_v27 = vadd.f32 %v3538_v14, %v798_v24  ;;  %v2037_v31 = vrot.slane %v1764_v22, 4  ;;  %v3384_v14 = vld [vmem:[%s4345_s0 + $0x100] sm:$0xff]  ;;  %v2035_v10 = vrot.slane %v2034_v61, 1  ;;  %v2787_v24 = vsel %vm2759_vm3, %v2018_v9, %v2012_v19 }
 0x1fe   :  { %v1048_v32 = vmax.f32 %v799_v27, 0.0  ;;  %v2038_v42 = vmax.f32 %v1764_v22, %v2037_v31  ;;  %v2036_v23 = vmax.f32 %v2034_v61, %v2035_v10  ;;  %v2788_v27 = vsel %vm2761_vm4, %v2024_v16, %v2787_v24 }
 0x1ff   :  { %v1490_v34 = vpop.f32.mrf.mxu1  ;;  %v2789_v31 = vsel %vm2763_vm5, %v2030_v20, %v2788_v27 }
 0x200   :  { %v1152_v37 = vpack.c.bf16 %v1048_v32, %v1047_v30  ;;  %v1491_v38 = vadd.f32 %v3616_v41, %v1490_v34  ;;  %v2039_v51 = vrot.slane %v2038_v42, 2  ;;  %v2790_v32 = vsel %vm2765_vm6, %v2036_v23, %v2789_v31 }
 0x201   :  { %3253 = vmatmul.msk.bf16.gmra.mxu3 %vm475_vm1, %v3389_v47 }
 0x202   :  { %v1765_v43 = vmax.f32 %v1491_v38, 0.0  ;;  %3311 = vmatmul.msk.bf16.gmra.mxu1 %vm1213_vm2, %v1152_v37  ;;  %v2040_v62 = vmax.f32 %v2038_v42, %v2039_v51 }
 0x203   :  { %v801_v45 = vpop.f32.mrf.mxu0 }
 0x204   :  { %v2043_v48 = vrot.slane %v1765_v43, 4  ;;  %v802_v0 = vadd.f32 %v3782_v63, %v801_v45  ;;  %v2041_v11 = vrot.slane %v2040_v62, 1 }
 0x206   :  { %v2044_v52 = vmax.f32 %v1765_v43, %v2043_v48  ;;  %3248 = vmatmul.msk.bf16.gmra.mxu0 %vm475_vm1, %v3384_v14  ;;  %v1049_v12 = vmax.f32 %v802_v0, 0.0  ;;  %v2042_v25 = vmax.f32 %v2040_v62, %v2041_v11  ;;  %v3390_v0 = vld [vmem:[%s4345_s0 + $0x130] sm:$0xff] }
 0x207   :  { %v1492_v55 = vpop.f32.mrf.mxu1 }
 0x208   :  { %v2045_v58 = vrot.slane %v2044_v52, 2  ;;  %v1493_v59 = vadd.f32 %v3616_v41, %v1492_v55  ;;  %v2791_v34 = vsel %vm2767_vm7, %v2042_v25, %v2790_v32  ;;  %v3823_v25 = vld [vmem:[%s4349_s4] ss:$0 sm:$0xff] }
 0x20a   :  { %v1766_v1 = vmax.f32 %v1493_v59, 0.0  ;;  %v2046_v3 = vmax.f32 %v2044_v52, %v2045_v58 }
 0x20b   :  { %v803_v4 = vpop.f32.mrf.mxu0 }
 0x20c   :  { %v2049_v7 = vrot.slane %v1766_v1, 4  ;;  %v804_v8 = vadd.f32 %v3782_v63, %v803_v4  ;;  %v2047_v17 = vrot.slane %v2046_v3, 1 }
 0x20e   :  { %v2050_v13 = vmax.f32 %v1766_v1, %v2049_v7  ;;  %v1050_v15 = vmax.f32 %v804_v8, 0.0  ;;  %v2048_v28 = vmax.f32 %v2046_v3, %v2047_v17 }
 0x20f   :  { %v1495_v18 = vpop.f32.mrf.mxu1 }
 0x210   :  { %v2051_v21 = vrot.slane %v2050_v13, 2  ;;  %v1153_v22 = vpack.c.bf16 %v1050_v15, %v1049_v12  ;;  %v2792_v37 = vsel %vm2769_vm8, %v2048_v28, %v2791_v34  ;;  %v1496_v59 = vadd.f32 %v3616_v41, %v1495_v18 }
 0x211   :  { %3254 = vmatmul.msk.bf16.gmra.mxu3 %vm475_vm1, %v3390_v0 }
 0x212   :  { %v2052_v26 = vmax.f32 %v2050_v13, %v2051_v21  ;;  %3312 = vmatmul.msk.bf16.gmra.mxu1 %vm1213_vm2, %v1153_v22  ;;  %v1767_v3 = vmax.f32 %v1496_v59, 0.0 }
 0x213   :  { %v806_v29 = vpop.f32.mrf.mxu0 }
 0x214   :  { %v2053_v30 = vrot.slane %v2052_v26, 1  ;;  %v807_v39 = vadd.f32 %v3782_v63, %v806_v29  ;;  %v2055_v12 = vrot.slane %v1767_v3, 4 }
 0x216   :  { %v2054_v33 = vmax.f32 %v2052_v26, %v2053_v30  ;;  %v1051_v43 = vmax.f32 %v807_v39, 0.0  ;;  %v2056_v22 = vmax.f32 %v1767_v3, %v2055_v12 }
 0x217   :  { %v1497_v36 = vpop.f32.mrf.mxu1 }
 0x218   :  { %v2793_v38 = vsel %vm2771_vm9, %v2054_v33, %v2792_v37  ;;  %v1498_v56 = vadd.f32 %v3616_v41, %v1497_v36  ;;  %v2057_v33 = vrot.slane %v2056_v22, 2 }
 0x219   :  { %2897 = vxpose.xlu0.b32.cont [4/16] %v2793_v38, 128 }
 0x21a   :  { %v1768_v61 = vmax.f32 %v1498_v56, 0.0 }
 0x21b   :  { %v808_v40 = vpop.f32.mrf.mxu0 }
 0x21c   :  { %v809_v42 = vadd.f32 %v3782_v63, %v808_v40  ;;  %v2061_v6 = vrot.slane %v1768_v61, 4  ;;  %v3391_v40 = vld [vmem:[%s4345_s0 + $0x138] sm:$0xff] }
 0x21e   :  { %v1052_v14 = vmax.f32 %v809_v42, 0.0  ;;  %v2062_v16 = vmax.f32 %v1768_v61, %v2061_v6 }
 0x21f   :  { %v1500_v44 = vpop.f32.mrf.mxu1 }
 0x220   :  { %v1154_v45 = vpack.c.bf16 %v1052_v14, %v1051_v43  ;;  %v1501_v57 = vadd.f32 %v3616_v41, %v1500_v44  ;;  %v2063_v27 = vrot.slane %v2062_v16, 2  ;;  %v2058_v14 = vmax.f32 %v2056_v22, %v2057_v33 }
 0x221   :  { %3255 = vmatmul.msk.bf16.gmra.mxu3 %vm475_vm1, %v3391_v40 }
 0x222   :  { %3313 = vmatmul.msk.bf16.gmra.mxu1 %vm1213_vm2, %v1154_v45  ;;  %v1769_v1 = vmax.f32 %v1501_v57, 0.0  ;;  %v2064_v36 = vmax.f32 %v2062_v16, %v2063_v27 }
 0x223   :  { %v811_v46 = vpop.f32.mrf.mxu0 }
 0x224   :  { %v812_v49 = vadd.f32 %v3782_v63, %v811_v46  ;;  %v2067_v10 = vrot.slane %v1769_v1, 4  ;;  %v2065_v47 = vrot.slane %v2064_v36, 1 }
 0x226   :  { %v1053_v52 = vmax.f32 %v812_v49, 0.0  ;;  %v2068_v21 = vmax.f32 %v1769_v1, %v2067_v10  ;;  %v2066_v59 = vmax.f32 %v2064_v36, %v2065_v47 }
 0x227   :  { %v1502_v48 = vpop.f32.mrf.mxu1 }
 0x228   :  { %v1503_v60 = vadd.f32 %v3616_v41, %v1502_v48  ;;  %v2069_v31 = vrot.slane %v2068_v21, 2 }
 0x22a   :  { %v1770_v4 = vmax.f32 %v1503_v60, 0.0  ;;  %v2070_v42 = vmax.f32 %v2068_v21, %v2069_v31 }
 0x22b   :  { %v813_v50 = vpop.f32.mrf.mxu0 }
 0x22c   :  { %v814_v51 = vadd.f32 %v3782_v63, %v813_v50  ;;  %v2073_v13 = vrot.slane %v1770_v4, 4 }
 0x22e   :  { %v1054_v53 = vmax.f32 %v814_v51, 0.0  ;;  %v2074_v23 = vmax.f32 %v1770_v4, %v2073_v13 }
 0x22f   :  { %v1505_v54 = vpop.f32.mrf.mxu1 }
 0x230   :  { %v1155_v55 = vpack.c.bf16 %v1054_v53, %v1053_v52  ;;  %v1506_v62 = vadd.f32 %v3616_v41, %v1505_v54  ;;  %v2075_v34 = vrot.slane %v2074_v23, 2  ;;  %v2071_v52 = vrot.slane %v2070_v42, 1 }
 0x232   :  { %3314 = vmatmul.msk.bf16.gmra.mxu1 %vm1213_vm2, %v1155_v55  ;;  %v1771_v7 = vmax.f32 %v1506_v62, 0.0  ;;  %v2076_v44 = vmax.f32 %v2074_v23, %v2075_v34  ;;  %v2059_v55 = vrot.slane %v2058_v14, 1  ;;  %v3393_v34 = vld [vmem:[%s4345_s0 + $0x148] sm:$0xff] }
 0x233   :  { %v816_v58 = vpop.f32.mrf.mxu0 }
 0x234   :  { %v817_v8 = vadd.f32 %v3782_v63, %v816_v58  ;;  %v2079_v17 = vrot.slane %v1771_v7, 4  ;;  %v2077_v56 = vrot.slane %v2076_v44, 1 }
 0x236   :  { %v1055_v18 = vmax.f32 %v817_v8, 0.0  ;;  %v2080_v28 = vmax.f32 %v1771_v7, %v2079_v17  ;;  %v2078_v6 = vmax.f32 %v2076_v44, %v2077_v56 }
 0x237   :  { %v1507_v2 = vpop.f32.mrf.mxu1 }
 0x238   :  { %v1508_v5 = vadd.f32 %v3616_v41, %v1507_v2  ;;  %v2081_v37 = vrot.slane %v2080_v28, 2  ;;  %v2072_v2 = vmax.f32 %v2070_v42, %v2071_v52  ;;  %v3394_v52 = vld [vmem:[%s4345_s0 + $0x150] sm:$0xff] }
 0x23a   :  { %v1772_v9 = vmax.f32 %v1508_v5, 0.0  ;;  %v2082_v48 = vmax.f32 %v2080_v28, %v2081_v37  ;;  %v2060_v5 = vmax.f32 %v2058_v14, %v2059_v55 }
 0x23b   :  { %v818_v11 = vpop.f32.mrf.mxu0 }
 0x23c   :  { %v819_v15 = vadd.f32 %v3782_v63, %v818_v11  ;;  %v2085_v19 = vrot.slane %v1772_v9, 4  ;;  %v2083_v60 = vrot.slane %v2082_v48, 1  ;;  %v2794_v10 = vsel %vm2759_vm3, %v2066_v59, %v2060_v5 }
 0x23d   :  { %v2795_v13 = vsel %vm2761_vm4, %v2072_v2, %v2794_v10 }
 0x23e   :  { %v1056_v20 = vmax.f32 %v819_v15, 0.0  ;;  %v2086_v29 = vmax.f32 %v1772_v9, %v2085_v19  ;;  %v2084_v9 = vmax.f32 %v2082_v48, %v2083_v60 }
 0x23f   :  { %v1510_v41 = vpop.f32.mrf.mxu1 }
 0x240   :  { %v1156_v24 = vpack.c.bf16 %v1056_v20, %v1055_v18  ;;  %v1511_v26 = vadd.f32 %v3823_v25, %v1510_v41  ;;  %v2087_v38 = vrot.slane %v2086_v29, 2  ;;  %v2796_v18 = vsel %vm2763_vm5, %v2078_v6, %v2795_v13  ;;  %v3392_v41 = vld [vmem:[%s4345_s0 + $0x140] sm:$0xff] }
 0x241   :  { %v2797_v19 = vsel %vm2765_vm6, %v2084_v9, %v2796_v18  ;;  %3256 = vmatmul.msk.bf16.gmra.mxu3 %vm475_vm1, %v3392_v41 }
 0x242   :  { %v1773_v30 = vmax.f32 %v1511_v26, 0.0  ;;  %3315 = vmatmul.msk.bf16.gmra.mxu1 %vm1213_vm2, %v1156_v24  ;;  %v2088_v49 = vmax.f32 %v2086_v29, %v2087_v38  ;;  %v3854_v38 = vpop.f32.mrf.mxu3 }
 0x243   :  { %v821_v32 = vpop.f32.mrf.mxu0 }
 0x244   :  { %v2091_v35 = vrot.slane %v1773_v30, 4  ;;  %v822_v50 = vadd.f32 %v3782_v63, %v821_v32  ;;  %v2089_v61 = vrot.slane %v2088_v49, 1 }
 0x246   :  { %v2092_v39 = vmax.f32 %v1773_v30, %v2091_v35  ;;  %v1057_v62 = vmax.f32 %v822_v50, 0.0  ;;  %v2090_v11 = vmax.f32 %v2088_v49, %v2089_v61 }
 0x247   :  { %v1512_v43 = vpop.f32.mrf.mxu1 }
 0x248   :  { %v2093_v45 = vrot.slane %v2092_v39, 2  ;;  %v1513_v46 = vadd.f32 %v3823_v25, %v1512_v43  ;;  %v2798_v21 = vsel %vm2767_vm7, %v2090_v11, %v2797_v19 }
 0x24a   :  { %v1774_v51 = vmax.f32 %v1513_v46, 0.0  ;;  %v2094_v53 = vmax.f32 %v2092_v39, %v2093_v45  ;;  %v3860_v47 = vpop.f32.mrf.mxu3 }
 0x24b   :  { %v823_v54 = vpop.f32.mrf.mxu0 }
 0x24c   :  { %v2097_v57 = vrot.slane %v1774_v51, 4  ;;  %v824_v58 = vadd.f32 %v3782_v63, %v823_v54  ;;  %v2095_v3 = vrot.slane %v2094_v53, 1 }
 0x24e   :  { %v2098_v0 = vmax.f32 %v1774_v51, %v2097_v57  ;;  %v1058_v1 = vmax.f32 %v824_v58, 0.0  ;;  %v2096_v15 = vmax.f32 %v2094_v53, %v2095_v3 }
 0x24f   :  { %v1515_v4 = vpop.f32.mrf.mxu1 }
 0x250   :  { %v2099_v7 = vrot.slane %v2098_v0, 2  ;;  %v1157_v8 = vpack.c.bf16 %v1058_v1, %v1057_v62  ;;  %v2799_v23 = vsel %vm2769_vm8, %v2096_v15, %v2798_v21  ;;  %v1516_v48 = vadd.f32 %v3823_v25, %v1515_v4 }
 0x251   :  { %3257 = vmatmul.msk.bf16.gmra.mxu3 %vm475_vm1, %v3393_v34 }
 0x252   :  { %v2100_v12 = vmax.f32 %v2098_v0, %v2099_v7  ;;  %3316 = vmatmul.msk.bf16.gmra.mxu1 %vm1213_vm2, %v1157_v8  ;;  %v1775_v55 = vmax.f32 %v1516_v48, 0.0  ;;  %v3871_v1 = vpop.f32.mrf.mxu3 }
 0x253   :  { %v826_v16 = vpop.f32.mrf.mxu0 }
 0x254   :  { %v2101_v17 = vrot.slane %v2100_v12, 1  ;;  %v827_v26 = vadd.f32 %v3782_v63, %v826_v16  ;;  %v2103_v2 = vrot.slane %v1775_v55, 4 }
 0x256   :  { %v2102_v20 = vmax.f32 %v2100_v12, %v2101_v17  ;;  %v1059_v29 = vmax.f32 %v827_v26, 0.0  ;;  %v2104_v12 = vmax.f32 %v1775_v55, %v2103_v2 }
 0x257   :  { %v1517_v22 = vpop.f32.mrf.mxu1 }
 0x258   :  { %v2800_v24 = vsel %vm2771_vm9, %v2102_v20, %v2799_v23  ;;  %v1518_v44 = vadd.f32 %v3823_v25, %v1517_v22  ;;  %v2105_v23 = vrot.slane %v2104_v12, 2 }
 0x259   :  { %2898 = vxpose.xlu0.b32.cont [5/16] %v2800_v24, 128 }
 0x25a   :  { %v1776_v50 = vmax.f32 %v1518_v44, 0.0  ;;  %v3876_v22 = vpop.f32.mrf.mxu3  ;;  %v2106_v34 = vmax.f32 %v2104_v12, %v2105_v23 }
 0x25b   :  { %v828_v27 = vpop.f32.mrf.mxu0 }
 0x25c   :  { %v829_v28 = vadd.f32 %v3782_v63, %v828_v27  ;;  %v2109_v58 = vrot.slane %v1776_v50, 4 }
 0x25e   :  { %v1060_v30 = vmax.f32 %v829_v28, 0.0  ;;  %v2110_v5 = vmax.f32 %v1776_v50, %v2109_v58 }
 0x25f   :  { %v1520_v31 = vpop.f32.mrf.mxu1 }
 0x260   :  { %v1158_v32 = vpack.c.bf16 %v1060_v30, %v1059_v29  ;;  %v1521_v45 = vadd.f32 %v3823_v25, %v1520_v31  ;;  %v2111_v17 = vrot.slane %v2110_v5, 2  ;;  %v3395_v31 = vld [vmem:[%s4345_s0 + $0x158] sm:$0xff] }
 0x261   :  { %3258 = vmatmul.msk.bf16.gmra.mxu3 %vm475_vm1, %v3394_v52 }
 0x262   :  { %3317 = vmatmul.msk.bf16.gmra.mxu1 %vm1213_vm2, %v1158_v32  ;;  %v1777_v53 = vmax.f32 %v1521_v45, 0.0  ;;  %v2112_v27 = vmax.f32 %v2110_v5, %v2111_v17  ;;  %v3396_v17 = vld [vmem:[%s4345_s0 + $0x160] sm:$0xff] }
 0x263   :  { %v831_v33 = vpop.f32.mrf.mxu0 }
 0x264   :  { %v832_v36 = vadd.f32 %v3782_v63, %v831_v33  ;;  %v2115_v62 = vrot.slane %v1777_v53, 4  ;;  %v3884_v48 = vpop.f32.mrf.mxu3 }
 0x266   :  { %v1061_v40 = vmax.f32 %v832_v36, 0.0  ;;  %v2116_v10 = vmax.f32 %v1777_v53, %v2115_v62 }
 0x267   :  { %v1522_v35 = vpop.f32.mrf.mxu1 }
 0x268   :  { %v1523_v49 = vadd.f32 %v3823_v25, %v1522_v35  ;;  %v2117_v21 = vrot.slane %v2116_v10, 2 }
 0x26a   :  { %v1778_v56 = vmax.f32 %v1523_v49, 0.0  ;;  %v2118_v32 = vmax.f32 %v2116_v10, %v2117_v21  ;;  %v2107_v49 = vrot.slane %v2106_v34, 1  ;;  %v849_v21 = vadd.f32 %v3782_v63, %v3860_v47 }
 0x26b   :  { %v833_v37 = vpop.f32.mrf.mxu0 }
 0x26c   :  { %v834_v39 = vadd.f32 %v3782_v63, %v833_v37  ;;  %v2121_v3 = vrot.slane %v1778_v56, 4  ;;  %v2119_v44 = vrot.slane %v2118_v32, 1  ;;  %v2108_v62 = vmax.f32 %v2106_v34, %v2107_v49  ;;  %v858_v10 = vpop.f32.mrf.mxu3 }
 0x26e   :  { %v1062_v42 = vmax.f32 %v834_v39, 0.0  ;;  %v2122_v13 = vmax.f32 %v1778_v56, %v2121_v3  ;;  %v2113_v39 = vrot.slane %v2112_v27, 1 }
 0x26f   :  { %v1525_v43 = vpop.f32.mrf.mxu1 }
 0x270   :  { %v1159_v14 = vpack.c.bf16 %v1062_v42, %v1061_v40  ;;  %v1526_v51 = vadd.f32 %v3823_v25, %v1525_v43  ;;  %v2123_v24 = vrot.slane %v2122_v13, 2  ;;  %v2114_v53 = vmax.f32 %v2112_v27, %v2113_v39 }
 0x271   :  { %3259 = vmatmul.msk.bf16.gmra.mxu3 %vm475_vm1, %v3395_v31  ;;  %v854_v31 = vadd.f32 %v3782_v63, %v3876_v22 }
 0x272   :  { %3318 = vmatmul.msk.bf16.gmra.mxu1 %vm1213_vm2, %v1159_v14  ;;  %v1779_v59 = vmax.f32 %v1526_v51, 0.0  ;;  %v2124_v35 = vmax.f32 %v2122_v13, %v2123_v24  ;;  %v2801_v5 = vsel %vm2759_vm3, %v2114_v53, %v2108_v62 }
 0x273   :  { %v836_v46 = vpop.f32.mrf.mxu0  ;;  %v1070_v34 = vmax.f32 %v854_v31, 0.0 }
 0x274   :  { %v837_v60 = vadd.f32 %v3782_v63, %v836_v46  ;;  %v2127_v6 = vrot.slane %v1779_v59, 4  ;;  %v2125_v50 = vrot.slane %v2124_v35, 1  ;;  %v3903_v23 = vpop.f32.mrf.mxu3 }
 0x276   :  { %v1063_v7 = vmax.f32 %v837_v60, 0.0  ;;  %v2128_v18 = vmax.f32 %v1779_v59, %v2127_v6  ;;  %v2120_v59 = vmax.f32 %v2118_v32, %v2119_v44 }
 0x277   :  { %v1527_v54 = vpop.f32.mrf.mxu1 }
 0x278   :  { %v1528_v57 = vadd.f32 %v3823_v25, %v1527_v54  ;;  %v2129_v28 = vrot.slane %v2128_v18, 2 }
 0x27a   :  { %v1780_v61 = vmax.f32 %v1528_v57, 0.0  ;;  %v2130_v40 = vmax.f32 %v2128_v18, %v2129_v28 }
 0x27b   :  { %v838_v0 = vpop.f32.mrf.mxu0 }
 0x27c   :  { %v839_v4 = vadd.f32 %v3782_v63, %v838_v0  ;;  %v2133_v8 = vrot.slane %v1780_v61, 4  ;;  %v2131_v54 = vrot.slane %v2130_v40, 1  ;;  %v2126_v0 = vmax.f32 %v2124_v35, %v2125_v50 }
 0x27d   :  { %v857_v50 = vadd.f32 %v3782_v63, %v3884_v48 }
 0x27e   :  { %v1064_v9 = vmax.f32 %v839_v4, 0.0  ;;  %v2134_v19 = vmax.f32 %v1780_v61, %v2133_v8  ;;  %v2132_v4 = vmax.f32 %v2130_v40, %v2131_v54  ;;  %v2802_v8 = vsel %vm2761_vm4, %v2120_v59, %v2801_v5 }
 0x27f   :  { %v1530_v11 = vpop.f32.mrf.mxu1  ;;  %v2803_v12 = vsel %vm2763_vm5, %v2126_v0, %v2802_v8 }
 0x280   :  { %v1160_v15 = vpack.c.bf16 %v1064_v9, %v1063_v7  ;;  %v1531_v16 = vadd.f32 %v3823_v25, %v1530_v11  ;;  %v2135_v29 = vrot.slane %v2134_v19, 2  ;;  %v2804_v13 = vsel %vm2765_vm6, %v2132_v4, %v2803_v12 }
 0x281   :  { %3260 = vmatmul.msk.bf16.gmra.mxu3 %vm475_vm1, %v3396_v17 }
 0x282   :  { %v1781_v20 = vmax.f32 %v1531_v16, 0.0  ;;  %3319 = vmatmul.msk.bf16.gmra.mxu1 %vm1213_vm2, %v1160_v15  ;;  %v2136_v42 = vmax.f32 %v2134_v19, %v2135_v29  ;;  %v3906_v29 = vpop.f32.mrf.mxu3 }
 0x283   :  { %v841_v41 = vpop.f32.mrf.mxu0 }
 0x284   :  { %v2139_v26 = vrot.slane %v1781_v20, 4  ;;  %v842_v43 = vadd.f32 %v3782_v63, %v841_v41  ;;  %v2137_v55 = vrot.slane %v2136_v42, 1 }
 0x286   :  { %v2140_v30 = vmax.f32 %v1781_v20, %v2139_v26  ;;  %v1065_v56 = vmax.f32 %v842_v43, 0.0  ;;  %v2138_v6 = vmax.f32 %v2136_v42, %v2137_v55  ;;  %v847_v20 = vadd.f32 %v3782_v63, %v3854_v38  ;;  %v3397_v38 = vld [vmem:[%s4345_s0 + $0x168] sm:$0xff] }
 0x287   :  { %v1532_v33 = vpop.f32.mrf.mxu1  ;;  %v1068_v26 = vmax.f32 %v849_v21, 0.0 }
 0x288   :  { %v2141_v36 = vrot.slane %v2140_v30, 2  ;;  %v1533_v37 = vadd.f32 %v3823_v25, %v1532_v33  ;;  %v2805_v16 = vsel %vm2767_vm7, %v2138_v6, %v2804_v13  ;;  %v1067_v24 = vmax.f32 %v847_v20, 0.0 }
 0x28a   :  { %v1782_v14 = vmax.f32 %v1533_v37, 0.0  ;;  %v2142_v45 = vmax.f32 %v2140_v30, %v2141_v36  ;;  %v1162_v28 = vpack.c.bf16 %v1068_v26, %v1067_v24  ;;  %v852_v30 = vadd.f32 %v3782_v63, %v3871_v1  ;;  %v3916_v32 = vpop.f32.mrf.mxu3 }
 0x28b   :  { %v843_v46 = vpop.f32.mrf.mxu0 }
 0x28c   :  { %v2145_v51 = vrot.slane %v1782_v14, 4  ;;  %v844_v52 = vadd.f32 %v3782_v63, %v843_v46  ;;  %v2143_v60 = vrot.slane %v2142_v45, 1  ;;  %v1069_v33 = vmax.f32 %v852_v30, 0.0 }
 0x28d   :  { %v864_v30 = vadd.f32 %v3782_v63, %v3906_v29 }
 0x28e   :  { %v2146_v57 = vmax.f32 %v1782_v14, %v2145_v51  ;;  %v1066_v58 = vmax.f32 %v844_v52, 0.0  ;;  %v2144_v9 = vmax.f32 %v2142_v45, %v2143_v60  ;;  %v1163_v36 = vpack.c.bf16 %v1070_v34, %v1069_v33  ;;  %v3398_v14 = vld [vmem:[%s4345_s0 + $0x170] sm:$0xff] }
 0x28f   :  { %v1535_v61 = vpop.f32.mrf.mxu1  ;;  %v859_v51 = vadd.f32 %v3782_v63, %v858_v10  ;;  %v1071_v60 = vmax.f32 %v857_v50, 0.0 }
 0x290   :  { %v2147_v2 = vrot.slane %v2146_v57, 2  ;;  %v1161_v3 = vpack.c.bf16 %v1066_v58, %v1065_v56  ;;  %v2806_v19 = vsel %vm2769_vm8, %v2144_v9, %v2805_v16  ;;  %v1536_v39 = vadd.f32 %v3823_v25, %v1535_v61 }
 0x291   :  { %3261 = vmatmul.msk.bf16.gmra.mxu3 %vm475_vm1, %v3397_v38  ;;  %v1072_v61 = vmax.f32 %v859_v51, 0.0 }
 0x292   :  { %v2148_v7 = vmax.f32 %v2146_v57, %v2147_v2  ;;  %3320 = vmatmul.msk.bf16.vlgmr.msra.gmra.mxu2 %vm1213_vm2, %v1161_v3  ;;  %v3922_v1 = vpop.f32.mrf.mxu3  ;;  %v1783_v44 = vmax.f32 %v1536_v39, 0.0 }
 0x294   :  { %v2149_v11 = vrot.slane %v2148_v7, 1  ;;  %v2151_v56 = vrot.slane %v1783_v44, 4 }
 0x296   :  { %v2150_v15 = vmax.f32 %v2148_v7, %v2149_v11  ;;  %v2152_v48 = vmax.f32 %v1783_v44, %v2151_v56  ;;  %v1164_v7 = vpack.c.bf16 %v1072_v61, %v1071_v60 }
 0x297   :  { %v1537_v18 = vpop.f32.mrf.mxu1 }
 0x298   :  { %v2807_v41 = vsel %vm2771_vm9, %v2150_v15, %v2806_v19  ;;  %v1538_v37 = vadd.f32 %v3823_v25, %v1537_v18  ;;  %v2153_v12 = vrot.slane %v2152_v48, 2 }
 0x299   :  { %2899 = vxpose.xlu0.b32.cont [6/16] %v2807_v41, 128  ;;  %v3399_v41 = vld [vmem:[%s4345_s0 + $0x178] sm:$0xff] }
 0x29a   :  { %v1784_v43 = vmax.f32 %v1538_v37, 0.0  ;;  %v3934_v58 = vpop.f32.mrf.mxu3  ;;  %v2154_v24 = vmax.f32 %v2152_v48, %v2153_v12 }
 0x29c   :  { %v2157_v54 = vrot.slane %v1784_v43, 4  ;;  %v2155_v37 = vrot.slane %v2154_v24, 1 }
 0x29e   :  { %v2158_v0 = vmax.f32 %v1784_v43, %v2157_v54  ;;  %v1074_v43 = vmax.f32 %v864_v30, 0.0 }
 0x29f   :  { %v1540_v27 = vpop.f32.mrf.mxu1 }
 0x2a0   :  { %v1541_v40 = vadd.f32 %v3823_v25, %v1540_v27  ;;  %v2159_v9 = vrot.slane %v2158_v0, 2  ;;  %v862_v27 = vadd.f32 %v3782_v63, %v3903_v23 }
 0x2a1   :  { %3262 = vmatmul.msk.bf16.gmra.mxu3 %vm475_vm1, %v3398_v14 }
 0x2a2   :  { %3321 = vmatmul.msk.bf16.gmra.mxu2 %vm1213_vm2, %v1162_v28  ;;  %v1785_v45 = vmax.f32 %v1541_v40, 0.0  ;;  %v3938_v15 = vpop.f32.mrf.mxu3  ;;  %v2160_v19 = vmax.f32 %v2158_v0, %v2159_v9  ;;  %v867_v9 = vadd.f32 %v3782_v63, %v3916_v32  ;;  %v3401_v32 = vld [vmem:[%s4345_s0 + $0x188] sm:$0xff] }
 0x2a4   :  { %v2163_v57 = vrot.slane %v1785_v45, 4  ;;  %v2161_v34 = vrot.slane %v2160_v19, 1 }
 0x2a6   :  { %v2164_v3 = vmax.f32 %v1785_v45, %v2163_v57  ;;  %v2162_v45 = vmax.f32 %v2160_v19, %v2161_v34  ;;  %v3402_v34 = vld [vmem:[%s4345_s0 + $0x190] sm:$0xff] }
 0x2a7   :  { %v1542_v47 = vpop.f32.mrf.mxu1 }
 0x2a8   :  { %v1543_v22 = vadd.f32 %v3823_v25, %v1542_v47  ;;  %v2165_v13 = vrot.slane %v2164_v3, 2 }
 0x2aa   :  { %v1786_v49 = vmax.f32 %v1543_v22, 0.0  ;;  %v2166_v26 = vmax.f32 %v2164_v3, %v2165_v13  ;;  %v3949_v22 = vpop.f32.mrf.mxu3  ;;  %v1075_v13 = vmax.f32 %v867_v9, 0.0 }
 0x2ac   :  { %v2169_v59 = vrot.slane %v1786_v49, 4  ;;  %v2167_v39 = vrot.slane %v2166_v26, 1 }
 0x2ae   :  { %v2170_v5 = vmax.f32 %v1786_v49, %v2169_v59  ;;  %v2168_v49 = vmax.f32 %v2166_v26, %v2167_v39 }
 0x2af   :  { %v1545_v35 = vpop.f32.mrf.mxu1 }
 0x2b0   :  { %v1546_v42 = vadd.f32 %v3823_v25, %v1545_v35  ;;  %v2171_v16 = vrot.slane %v2170_v5, 2 }
 0x2b1   :  { %3263 = vmatmul.msk.bf16.gmra.mxu3 %vm475_vm1, %v3399_v41 }
 0x2b2   :  { %3322 = vmatmul.msk.bf16.gmra.mxu2 %vm1213_vm2, %v1163_v36  ;;  %v1787_v53 = vmax.f32 %v1546_v42, 0.0  ;;  %v2172_v38 = vmax.f32 %v2170_v5, %v2171_v16  ;;  %v1073_v42 = vmax.f32 %v862_v27, 0.0  ;;  %v878_v0 = vpop.f32.mrf.mxu3 }
 0x2b4   :  { %v2175_v62 = vrot.slane %v1787_v53, 4  ;;  %v2173_v23 = vrot.slane %v2172_v38, 1 }
 0x2b6   :  { %v2176_v8 = vmax.f32 %v1787_v53, %v2175_v62  ;;  %v2174_v53 = vmax.f32 %v2172_v38, %v2173_v23  ;;  %v879_v23 = vadd.f32 %v3782_v63, %v878_v0 }
 0x2b7   :  { %v1547_v46 = vpop.f32.mrf.mxu1 }
 0x2b8   :  { %v1548_v52 = vadd.f32 %v3823_v25, %v1547_v46  ;;  %v2177_v18 = vrot.slane %v2176_v8, 2 }
 0x2ba   :  { %v1788_v55 = vmax.f32 %v1548_v52, 0.0  ;;  %v2178_v33 = vmax.f32 %v2176_v8, %v2177_v18  ;;  %v2156_v52 = vmax.f32 %v2154_v24, %v2155_v37 }
 0x2bc   :  { %v2181_v2 = vrot.slane %v1788_v55, 4  ;;  %v2179_v44 = vrot.slane %v2178_v33, 1  ;;  %v2808_v57 = vsel %vm2759_vm3, %v2162_v45, %v2156_v52 }
 0x2bd   :  { %v2809_v61 = vsel %vm2761_vm4, %v2168_v49, %v2808_v57 }
 0x2be   :  { %v2182_v10 = vmax.f32 %v1788_v55, %v2181_v2  ;;  %v1165_v55 = vpack.c.bf16 %v1074_v43, %v1073_v42  ;;  %v2180_v56 = vmax.f32 %v2178_v33, %v2179_v44  ;;  %v2810_v48 = vsel %vm2763_vm5, %v2174_v53, %v2809_v61 }
 0x2bf   :  { %v1550_v4 = vpop.f32.mrf.mxu1 }
 0x2c0   :  { %v1551_v6 = vadd.f32 %v3823_v25, %v1550_v4  ;;  %v2183_v20 = vrot.slane %v2182_v10, 2  ;;  %v2811_v3 = vsel %vm2765_vm6, %v2180_v56, %v2810_v48 }
 0x2c2   :  { %v1789_v11 = vmax.f32 %v1551_v6, 0.0  ;;  %3323 = vmatmul.msk.bf16.gmra.mxu2 %vm1213_vm2, %v1164_v7  ;;  %v2184_v35 = vmax.f32 %v2182_v10, %v2183_v20  ;;  %v3400_v6 = vld [vmem:[%s4345_s0 + $0x180] sm:$0xff]  ;;  %v869_v10 = vadd.f32 %v3782_v63, %v3922_v1  ;;  %v872_v20 = vadd.f32 %v3782_v63, %v3934_v58 }
 0x2c3   :  { %3264 = vmatmul.msk.bf16.gmra.mxu3 %vm475_vm1, %v3400_v6 }
 0x2c4   :  { %v2187_v17 = vrot.slane %v1789_v11, 4  ;;  %v2185_v29 = vrot.slane %v2184_v35, 1  ;;  %v3967_v12 = vpop.f32.mrf.mxu3  ;;  %v1076_v16 = vmax.f32 %v869_v10, 0.0  ;;  %v1077_v24 = vmax.f32 %v872_v20, 0.0 }
 0x2c6   :  { %v2188_v21 = vmax.f32 %v1789_v11, %v2187_v17  ;;  %v2186_v59 = vmax.f32 %v2184_v35, %v2185_v29  ;;  %v1166_v18 = vpack.c.bf16 %v1076_v16, %v1075_v13 }
 0x2c7   :  { %v1552_v28 = vpop.f32.mrf.mxu1 }
 0x2c8   :  { %v2189_v47 = vrot.slane %v2188_v21, 2  ;;  %v1553_v31 = vadd.f32 %v3823_v25, %v1552_v28  ;;  %v2812_v5 = vsel %vm2767_vm7, %v2186_v59, %v2811_v3 }
 0x2ca   :  { %v1790_v36 = vmax.f32 %v1553_v31, 0.0  ;;  %v2190_v40 = vmax.f32 %v2188_v21, %v2189_v47  ;;  %v874_v21 = vadd.f32 %v3782_v63, %v3938_v15 }
 0x2cc   :  { %v2193_v14 = vrot.slane %v1790_v36, 4  ;;  %v2191_v50 = vrot.slane %v2190_v40, 1  ;;  %v3970_v19 = vpop.f32.mrf.mxu3  ;;  %v1078_v26 = vmax.f32 %v874_v21, 0.0 }
 0x2cd   :  { %v884_v20 = vadd.f32 %v3782_v63, %v3970_v19 }
 0x2ce   :  { %v2194_v46 = vmax.f32 %v1790_v36, %v2193_v14  ;;  %v2192_v62 = vmax.f32 %v2190_v40, %v2191_v50  ;;  %v1167_v28 = vpack.c.bf16 %v1078_v26, %v1077_v24  ;;  %v877_v40 = vadd.f32 %v3782_v63, %v3949_v22 }
 0x2cf   :  { %v1555_v51 = vpop.f32.mrf.mxu1 }
 0x2d0   :  { %v2195_v54 = vrot.slane %v2194_v46, 2  ;;  %v2813_v8 = vsel %vm2769_vm8, %v2192_v62, %v2812_v5  ;;  %v1556_v47 = vadd.f32 %v3823_v25, %v1555_v51  ;;  %v1079_v50 = vmax.f32 %v877_v40, 0.0 }
 0x2d1   :  { %v1080_v51 = vmax.f32 %v879_v23, 0.0 }
 0x2d2   :  { %v2196_v60 = vmax.f32 %v2194_v46, %v2195_v54  ;;  %3324 = vmatmul.msk.bf16.gmra.mxu2 %vm1213_vm2, %v1165_v55  ;;  %v1791_v35 = vmax.f32 %v1556_v47, 0.0 }
 0x2d3   :  { %3265 = vmatmul.msk.bf16.gmra.mxu3 %vm475_vm1, %v3401_v32 }
 0x2d4   :  { %v2197_v2 = vrot.slane %v2196_v60, 1  ;;  %v3980_v41 = vpop.f32.mrf.mxu3  ;;  %v2199_v45 = vrot.slane %v1791_v35, 4 }
 0x2d6   :  { %v2198_v4 = vmax.f32 %v2196_v60, %v2197_v2  ;;  %v2200_v22 = vmax.f32 %v1791_v35, %v2199_v45  ;;  %v1168_v60 = vpack.c.bf16 %v1080_v51, %v1079_v50 }
 0x2d7   :  { %v1557_v7 = vpop.f32.mrf.mxu1 }
 0x2d8   :  { %v2814_v11 = vsel %vm2771_vm9, %v2198_v4, %v2813_v8  ;;  %v1558_v38 = vadd.f32 %v3823_v25, %v1557_v7  ;;  %v2201_v48 = vrot.slane %v2200_v22, 2 }
 0x2d9   :  { %2900 = vxpose.xlu0.b32.cont [7/16] %v2814_v11, 128  ;;  %v3403_v11 = vld [vmem:[%s4345_s0 + $0x198] sm:$0xff] }
 0x2da   :  { %v1792_v33 = vmax.f32 %v1558_v38, 0.0  ;;  %v2202_v13 = vmax.f32 %v2200_v22, %v2201_v48 }
 0x2dc   :  { %v3986_v58 = vpop.f32.mrf.mxu3  ;;  %v2205_v14 = vrot.slane %v1792_v33, 4  ;;  %v2203_v38 = vrot.slane %v2202_v13, 1 }
 0x2de   :  { %v2206_v53 = vmax.f32 %v1792_v33, %v2205_v14  ;;  %v1082_v33 = vmax.f32 %v884_v20, 0.0  ;;  %v2204_v40 = vmax.f32 %v2202_v13, %v2203_v38 }
 0x2df   :  { %v1560_v17 = vpop.f32.mrf.mxu1 }
 0x2e0   :  { %v1561_v30 = vadd.f32 %v3823_v25, %v1560_v17  ;;  %v2207_v62 = vrot.slane %v2206_v53, 2  ;;  %v882_v17 = vadd.f32 %v3782_v63, %v3967_v12 }
 0x2e2   :  { %3325 = vmatmul.msk.bf16.gmra.mxu2 %vm1213_vm2, %v1166_v18  ;;  %v1793_v36 = vmax.f32 %v1561_v30, 0.0  ;;  %v2208_v8 = vmax.f32 %v2206_v53, %v2207_v62  ;;  %v1081_v12 = vmax.f32 %v882_v17, 0.0 }
 0x2e3   :  { %3266 = vmatmul.msk.bf16.gmra.mxu3 %vm475_vm1, %v3402_v34 }
 0x2e4   :  { %v2211_v29 = vrot.slane %v1793_v36, 4  ;;  %v3998_v46 = vpop.f32.mrf.mxu3  ;;  %v2209_v26 = vrot.slane %v2208_v8, 1 }
 0x2e6   :  { %v2212_v55 = vmax.f32 %v1793_v36, %v2211_v29  ;;  %v2210_v36 = vmax.f32 %v2208_v8, %v2209_v26 }
 0x2e7   :  { %v1562_v1 = vpop.f32.mrf.mxu1 }
 0x2e8   :  { %v1563_v15 = vadd.f32 %v3823_v25, %v1562_v1  ;;  %v2213_v3 = vrot.slane %v2212_v55, 2 }
 0x2ea   :  { %v1794_v39 = vmax.f32 %v1563_v15, 0.0  ;;  %v2214_v16 = vmax.f32 %v2212_v55, %v2213_v3 }
 0x2ec   :  { %v2217_v49 = vrot.slane %v1794_v39, 4  ;;  %v4002_v4 = vpop.f32.mrf.mxu3  ;;  %v2215_v47 = vrot.slane %v2214_v16, 1 }
 0x2ee   :  { %v2218_v57 = vmax.f32 %v1794_v39, %v2217_v49  ;;  %v2216_v19 = vmax.f32 %v2214_v16, %v2215_v47 }
 0x2ef   :  { %v1565_v27 = vpop.f32.mrf.mxu1 }
 0x2f0   :  { %v1566_v31 = vadd.f32 %v3823_v25, %v1565_v27  ;;  %v2219_v5 = vrot.slane %v2218_v57, 2 }
 0x2f2   :  { %3326 = vmatmul.msk.bf16.gmra.mxu2 %vm1213_vm2, %v1167_v28  ;;  %v1795_v43 = vmax.f32 %v1566_v31, 0.0  ;;  %v2220_v32 = vmax.f32 %v2218_v57, %v2219_v5  ;;  %v3404_v57 = vld [vmem:[%s4345_s0 + $0x1a0] sm:$0xff] }
 0x2f3   :  { %3267 = vmatmul.msk.bf16.gmra.mxu3 %vm475_vm1, %v3403_v11 }
 0x2f4   :  { %v2223_v52 = vrot.slane %v1795_v43, 4  ;;  %v896_v15 = vpop.f32.mrf.mxu3  ;;  %v2221_v31 = vrot.slane %v2220_v32, 1 }
 0x2f6   :  { %v2224_v61 = vmax.f32 %v1795_v43, %v2223_v52  ;;  %v2222_v23 = vmax.f32 %v2220_v32, %v2221_v31  ;;  %v1169_v43 = vpack.c.bf16 %v1082_v33, %v1081_v12 }
 0x2f7   :  { %v1567_v37 = vpop.f32.mrf.mxu1 }
 0x2f8   :  { %v1568_v42 = vadd.f32 %v3823_v25, %v1567_v37  ;;  %v2225_v7 = vrot.slane %v2224_v61, 2 }
 0x2fa   :  { %v1796_v44 = vmax.f32 %v1568_v42, 0.0  ;;  %v2226_v24 = vmax.f32 %v2224_v61, %v2225_v7 }
 0x2fc   :  { %v2229_v54 = vrot.slane %v1796_v44, 4  ;;  %v2227_v35 = vrot.slane %v2226_v24, 1  ;;  %v898_v51 = vpop.f32.mrf.mxu3 }
 0x2fe   :  { %v2230_v0 = vmax.f32 %v1796_v44, %v2229_v54  ;;  %v2228_v14 = vmax.f32 %v2226_v24, %v2227_v35  ;;  %v2815_v44 = vsel %vm2759_vm3, %v2210_v36, %v2204_v40 }
 0x2ff   :  { %v1570_v56 = vpop.f32.mrf.mxu1  ;;  %v2816_v49 = vsel %vm2761_vm4, %v2216_v19, %v2815_v44 }
 0x300   :  { %v1571_v59 = vadd.f32 %v3823_v25, %v1570_v56  ;;  %v2231_v9 = vrot.slane %v2230_v0, 2  ;;  %v2817_v53 = vsel %vm2763_vm5, %v2222_v23, %v2816_v49 }
 0x301   :  { %v2818_v22 = vsel %vm2765_vm6, %v2228_v14, %v2817_v53 }
 0x302   :  { %v1797_v2 = vmax.f32 %v1571_v59, 0.0  ;;  %3327 = vmatmul.msk.bf16.gmra.mxu2 %vm1213_vm2, %v1168_v60  ;;  %v2232_v27 = vmax.f32 %v2230_v0, %v2231_v9  ;;  %v4026_v60 = vld [vmem:[%s4347_s2] ss:$0 sm:$0xff] }
 0x303   :  { %v887_v61 = vadd.f32 %v4026_v60, %v3980_v41  ;;  %v889_v62 = vadd.f32 %v4026_v60, %v3986_v58  ;;  %3268 = vmatmul.msk.bf16.gmra.mxu3 %vm475_vm1, %v3404_v57  ;;  %v3405_v41 = vld [vmem:[%s4345_s0 + $0x1a8] sm:$0xff]  ;;  %v892_v58 = vadd.f32 %v4026_v60, %v3998_v46  ;;  %v894_v9 = vadd.f32 %v4026_v60, %v4002_v4  ;;  %v3406_v46 = vld [vmem:[%s4345_s0 + $0x1b0] sm:$0xff] }
 0x304   :  { %v2235_v6 = vrot.slane %v1797_v2, 4  ;;  %v2233_v37 = vrot.slane %v2232_v27, 1  ;;  %v897_v4 = vadd.f32 %v4026_v60, %v896_v15  ;;  %v899_v20 = vadd.f32 %v4026_v60, %v898_v51  ;;  %v3407_v51 = vld [vmem:[%s4345_s0 + $0x1b8] sm:$0xff] }
 0x305   :  { %v1083_v48 = vmax.f32 %v887_v61, 0.0  ;;  %v1084_v3 = vmax.f32 %v889_v62, 0.0  ;;  %v1085_v11 = vmax.f32 %v892_v58, 0.0  ;;  %v1086_v13 = vmax.f32 %v894_v9, 0.0 }
 0x306   :  { %v2236_v10 = vmax.f32 %v1797_v2, %v2235_v6  ;;  %v2234_v45 = vmax.f32 %v2232_v27, %v2233_v37  ;;  %v901_v2 = vpop.f32.mrf.mxu3  ;;  %v1087_v47 = vmax.f32 %v897_v4, 0.0 }
 0x307   :  { %v1572_v18 = vpop.f32.mrf.mxu1  ;;  %v1170_v6 = vpack.c.bf16 %v1084_v3, %v1083_v48  ;;  %v1171_v17 = vpack.c.bf16 %v1086_v13, %v1085_v11  ;;  %v4077_v11 = vld [vmem:[%s4349_s4] ss:$0 sm:$0xff] }
 0x308   :  { %v2237_v1 = vrot.slane %v2236_v10, 2  ;;  %v1573_v21 = vadd.f32 %v3823_v25, %v1572_v18  ;;  %v2819_v56 = vsel %vm2767_vm7, %v2234_v45, %v2818_v22 }
 0x30a   :  { %v1798_v28 = vmax.f32 %v1573_v21, 0.0  ;;  %v2238_v30 = vmax.f32 %v2236_v10, %v2237_v1 }
 0x30c   :  { %v2241_v34 = vrot.slane %v1798_v28, 4  ;;  %v2239_v39 = vrot.slane %v2238_v30, 1 }
 0x30e   :  { %v2242_v63 = vmax.f32 %v1798_v28, %v2241_v34  ;;  %v2240_v50 = vmax.f32 %v2238_v30, %v2239_v39  ;;  %v903_v7 = vpop.f32.mrf.mxu3  ;;  %v1088_v30 = vmax.f32 %v899_v20, 0.0 }
 0x310   :  { %v2243_v42 = vrot.slane %v2242_v63, 2  ;;  %v2820_v59 = vsel %vm2769_vm8, %v2240_v50, %v2819_v56 }
 0x312   :  { %v2244_v29 = vmax.f32 %v2242_v63, %v2243_v42  ;;  %3328 = vmatmul.msk.bf16.gmra.mxu2 %vm1213_vm2, %v1169_v43  ;;  %v1172_v63 = vpack.c.bf16 %v1088_v30, %v1087_v47 }
 0x313   :  { %3269 = vmatmul.msk.bf16.gmra.mxu3 %vm475_vm1, %v3405_v41 }
 0x314   :  { %v2245_v52 = vrot.slane %v2244_v29, 1 }
 0x315   :  { %v1575_v54 = vpop.f32.mrf.mxu2 }
 0x316   :  { %v2246_v55 = vmax.f32 %v2244_v29, %v2245_v52  ;;  %v4043_v10 = vpop.f32.mrf.mxu3  ;;  %v1576_v21 = vadd.f32 %v3823_v25, %v1575_v54  ;;  %v902_v54 = vadd.f32 %v4026_v60, %v901_v2 }
 0x318   :  { %v2821_v0 = vsel %vm2771_vm9, %v2246_v55, %v2820_v59  ;;  %v1799_v31 = vmax.f32 %v1576_v21, 0.0  ;;  %v904_v55 = vadd.f32 %v4026_v60, %v903_v7  ;;  %v1089_v3 = vmax.f32 %v902_v54, 0.0 }
 0x319   :  { %2901 = vxpose.xlu0.b32.cont [8/16] %v2821_v0, 128 }
 0x31a   :  { %v2247_v19 = vrot.slane %v1799_v31, 4 }
 0x31c   :  { %v2248_v44 = vmax.f32 %v1799_v31, %v2247_v19 }
 0x31d   :  { %v1577_v5 = vpop.f32.mrf.mxu2 }
 0x31e   :  { %v4046_v18 = vpop.f32.mrf.mxu3  ;;  %v1578_v1 = vadd.f32 %v3823_v25, %v1577_v5  ;;  %v2249_v57 = vrot.slane %v2248_v44, 2 }
 0x320   :  { %v1800_v27 = vmax.f32 %v1578_v1, 0.0  ;;  %v2250_v41 = vmax.f32 %v2248_v44, %v2249_v57 }
 0x322   :  { %3329 = vmatmul.msk.bf16.gmra.mxu2 %vm1213_vm2, %v1170_v6  ;;  %v2253_v35 = vrot.slane %v1800_v27, 4  ;;  %v1090_v6 = vmax.f32 %v904_v55, 0.0  ;;  %v2251_v4 = vrot.slane %v2250_v41, 1 }
 0x323   :  { %3270 = vmatmul.msk.bf16.gmra.mxu3 %vm475_vm1, %v3406_v46 }
 0x324   :  { %v2254_v23 = vmax.f32 %v1800_v27, %v2253_v35  ;;  %v1173_v46 = vpack.c.bf16 %v1090_v6, %v1089_v3 }
 0x325   :  { %v1580_v8 = vpop.f32.mrf.mxu2 }
 0x326   :  { %v1581_v24 = vadd.f32 %v3823_v25, %v1580_v8  ;;  %v4059_v38 = vpop.f32.mrf.mxu3  ;;  %v2255_v52 = vrot.slane %v2254_v23, 2 }
 0x328   :  { %v1801_v12 = vmax.f32 %v1581_v24, 0.0  ;;  %v2256_v0 = vmax.f32 %v2254_v23, %v2255_v52 }
 0x32a   :  { %v2259_v39 = vrot.slane %v1801_v12, 4 }
 0x32c   :  { %v2260_v45 = vmax.f32 %v1801_v12, %v2259_v39  ;;  %v2252_v12 = vmax.f32 %v2250_v41, %v2251_v4 }
 0x32d   :  { %v1582_v16 = vpop.f32.mrf.mxu2 }
 0x32e   :  { %v1583_v26 = vadd.f32 %v3823_v25, %v1582_v16  ;;  %v4063_v43 = vpop.f32.mrf.mxu3  ;;  %v2261_v59 = vrot.slane %v2260_v45, 2  ;;  %v2257_v16 = vrot.slane %v2256_v0, 1 }
 0x330   :  { %v1802_v33 = vmax.f32 %v1583_v26, 0.0  ;;  %v2262_v2 = vmax.f32 %v2260_v45, %v2261_v59  ;;  %v2258_v27 = vmax.f32 %v2256_v0, %v2257_v16  ;;  %v3409_v59 = vld [vmem:[%s4345_s0 + $0x1c8] sm:$0xff] }
 0x332   :  { %3330 = vmatmul.msk.bf16.gmra.mxu2 %vm1213_vm2, %v1171_v17  ;;  %v2265_v40 = vrot.slane %v1802_v33, 4  ;;  %v2263_v20 = vrot.slane %v2262_v2, 1 }
 0x333   :  { %3271 = vmatmul.msk.bf16.gmra.mxu3 %vm475_vm1, %v3407_v51 }
 0x334   :  { %v2266_v49 = vmax.f32 %v1802_v33, %v2265_v40  ;;  %v907_v40 = vadd.f32 %v4026_v60, %v4043_v10 }
 0x335   :  { %v1585_v32 = vpop.f32.mrf.mxu2 }
 0x336   :  { %v1586_v28 = vadd.f32 %v3823_v25, %v1585_v32  ;;  %v2267_v61 = vrot.slane %v2266_v49, 2  ;;  %v4072_v48 = vpop.f32.mrf.mxu3  ;;  %v1091_v51 = vmax.f32 %v907_v40, 0.0  ;;  %v3411_v40 = vld [vmem:[%s4345_s0 + $0x1d8] sm:$0xff] }
 0x338   :  { %v1803_v36 = vmax.f32 %v1586_v28, 0.0  ;;  %v2268_v9 = vmax.f32 %v2266_v49, %v2267_v61  ;;  %v912_v61 = vadd.f32 %v4026_v60, %v4059_v38  ;;  %v3410_v38 = vld [vmem:[%s4345_s0 + $0x1d0] sm:$0xff] }
 0x33a   :  { %v2271_v42 = vrot.slane %v1803_v36, 4  ;;  %v2269_v24 = vrot.slane %v2268_v9, 1 }
 0x33c   :  { %v2272_v53 = vmax.f32 %v1803_v36, %v2271_v42  ;;  %v2270_v35 = vmax.f32 %v2268_v9, %v2269_v24  ;;  %v909_v42 = vadd.f32 %v4026_v60, %v4046_v18 }
 0x33d   :  { %v1587_v15 = vpop.f32.mrf.mxu2 }
 0x33e   :  { %v1588_v34 = vadd.f32 %v3823_v25, %v1587_v15  ;;  %v918_v47 = vpop.f32.mrf.mxu3  ;;  %v2264_v15 = vmax.f32 %v2262_v2, %v2263_v20  ;;  %v1092_v52 = vmax.f32 %v909_v42, 0.0 }
 0x340   :  { %v1804_v37 = vmax.f32 %v1588_v34, 0.0  ;;  %v1174_v55 = vpack.c.bf16 %v1092_v52, %v1091_v51 }
 0x342   :  { %3331 = vmatmul.msk.bf16.gmra.mxu2 %vm1213_vm2, %v1172_v63  ;;  %v2277_v14 = vrot.slane %v1804_v37, 4  ;;  %v2822_v63 = vsel %vm2759_vm3, %v2258_v27, %v2252_v12 }
 0x344   :  { %v2278_v22 = vmax.f32 %v1804_v37, %v2277_v14  ;;  %v3408_v37 = vld [vmem:[%s4345_s0 + $0x1c0] sm:$0xff]  ;;  %v2823_v14 = vsel %vm2761_vm4, %v2264_v15, %v2822_v63 }
 0x345   :  { %v1590_v29 = vpop.f32.mrf.mxu2  ;;  %3272 = vmatmul.msk.bf16.gmra.mxu3 %vm475_vm1, %v3408_v37 }
 0x346   :  { %v1591_v50 = vadd.f32 %v3823_v25, %v1590_v29  ;;  %v2273_v25 = vrot.slane %v2272_v53, 2  ;;  %v2279_v5 = vrot.slane %v2278_v22, 2  ;;  %v2824_v29 = vsel %vm2763_vm5, %v2270_v35, %v2823_v14 }
 0x348   :  { %v1805_v56 = vmax.f32 %v1591_v50, 0.0  ;;  %v2274_v17 = vmax.f32 %v2272_v53, %v2273_v25  ;;  %v2280_v32 = vmax.f32 %v2278_v22, %v2279_v5  ;;  %v4093_v50 = vpop.f32.mrf.mxu3  ;;  %v1093_v25 = vmax.f32 %v912_v61, 0.0 }
 0x349   :  { %v922_v14 = vadd.f32 %v4026_v60, %v4093_v50 }
 0x34a   :  { %v2283_v62 = vrot.slane %v1805_v56, 4  ;;  %v2275_v28 = vrot.slane %v2274_v17, 1  ;;  %v2281_v30 = vrot.slane %v2280_v32, 1 }
 0x34c   :  { %v2284_v8 = vmax.f32 %v1805_v56, %v2283_v62  ;;  %v2276_v19 = vmax.f32 %v2274_v17, %v2275_v28  ;;  %v2282_v39 = vmax.f32 %v2280_v32, %v2281_v30  ;;  %v914_v62 = vadd.f32 %v4026_v60, %v4063_v43 }
 0x34d   :  { %v1592_v58 = vpop.f32.mrf.mxu2  ;;  %v917_v43 = vadd.f32 %v4026_v60, %v4072_v48 }
 0x34e   :  { %v2285_v7 = vrot.slane %v2284_v8, 2  ;;  %v1593_v13 = vadd.f32 %v4077_v11, %v1592_v58  ;;  %v2825_v49 = vsel %vm2765_vm6, %v2276_v19, %v2824_v29  ;;  %v1094_v3 = vmax.f32 %v914_v62, 0.0 }
 0x34f   :  { %v2826_v10 = vsel %vm2767_vm7, %v2282_v39, %v2825_v49  ;;  %v919_v58 = vadd.f32 %v4026_v60, %v918_v47 }
 0x350   :  { %v1806_v1 = vmax.f32 %v1593_v13, 0.0  ;;  %v2286_v21 = vmax.f32 %v2284_v8, %v2285_v7  ;;  %v923_v56 = vpop.f32.mrf.mxu3  ;;  %v1175_v6 = vpack.c.bf16 %v1094_v3, %v1093_v25 }
 0x352   :  { %v2289_v26 = vrot.slane %v1806_v1, 4  ;;  %3332 = vmatmul.msk.bf16.gmra.mxu2 %vm1213_vm2, %v1173_v46  ;;  %v2287_v33 = vrot.slane %v2286_v21, 1  ;;  %v1095_v46 = vmax.f32 %v917_v43, 0.0 }
 0x354   :  { %v2290_v31 = vmax.f32 %v1806_v1, %v2289_v26  ;;  %v2288_v44 = vmax.f32 %v2286_v21, %v2287_v33  ;;  %v1096_v1 = vmax.f32 %v919_v58, 0.0 }
 0x355   :  { %v1595_v34 = vpop.f32.mrf.mxu2  ;;  %3273 = vmatmul.msk.bf16.gmra.mxu3 %vm475_vm1, %v3409_v59 }
 0x356   :  { %v2291_v36 = vrot.slane %v2290_v31, 2  ;;  %v2827_v18 = vsel %vm2769_vm8, %v2288_v44, %v2826_v10  ;;  %v1596_v9 = vadd.f32 %v4077_v11, %v1595_v34  ;;  %v1176_v28 = vpack.c.bf16 %v1096_v1, %v1095_v46 }
 0x358   :  { %v2292_v23 = vmax.f32 %v2290_v31, %v2291_v36  ;;  %v4107_v0 = vpop.f32.mrf.mxu3  ;;  %v1807_v4 = vmax.f32 %v1596_v9, 0.0 }
 0x35a   :  { %v2293_v45 = vrot.slane %v2292_v23, 1  ;;  %v2295_v30 = vrot.slane %v1807_v4, 4 }
 0x35c   :  { %v2294_v53 = vmax.f32 %v2292_v23, %v2293_v45  ;;  %v2296_v36 = vmax.f32 %v1807_v4, %v2295_v30  ;;  %v924_v45 = vadd.f32 %v4026_v60, %v923_v56 }
 0x35d   :  { %v1597_v54 = vpop.f32.mrf.mxu2 }
 0x35e   :  { %v2828_v22 = vsel %vm2771_vm9, %v2294_v53, %v2827_v18  ;;  %v1598_v2 = vadd.f32 %v4077_v11, %v1597_v54  ;;  %v2297_v49 = vrot.slane %v2296_v36, 2 }
 0x35f   :  { %2902 = vxpose.xlu0.b32.cont [9/16] %v2828_v22, 128  ;;  %v1097_v22 = vmax.f32 %v922_v14, 0.0 }
 0x360   :  { %v4110_v8 = vpop.f32.mrf.mxu3  ;;  %v1808_v16 = vmax.f32 %v1598_v2, 0.0  ;;  %v2298_v61 = vmax.f32 %v2296_v36, %v2297_v49 }
 0x362   :  { %3333 = vmatmul.msk.bf16.gmra.mxu2 %vm1213_vm2, %v1174_v55  ;;  %v2301_v26 = vrot.slane %v1808_v16, 4  ;;  %v2299_v43 = vrot.slane %v2298_v61, 1 }
 0x364   :  { %v2302_v15 = vmax.f32 %v1808_v16, %v2301_v26 }
 0x365   :  { %v1600_v57 = vpop.f32.mrf.mxu2  ;;  %3274 = vmatmul.msk.bf16.gmra.mxu3 %vm475_vm1, %v3410_v38 }
 0x366   :  { %v1601_v7 = vadd.f32 %v4077_v11, %v1600_v57  ;;  %v2303_v23 = vrot.slane %v2302_v15, 2  ;;  %v1098_v57 = vmax.f32 %v924_v45, 0.0 }
 0x368   :  { %v4124_v32 = vpop.f32.mrf.mxu3  ;;  %v1809_v20 = vmax.f32 %v1601_v7, 0.0  ;;  %v2304_v10 = vmax.f32 %v2302_v15, %v2303_v23  ;;  %v1177_v38 = vpack.c.bf16 %v1098_v57, %v1097_v22 }
 0x36a   :  { %v2307_v31 = vrot.slane %v1809_v20, 4 }
 0x36c   :  { %v2308_v37 = vmax.f32 %v1809_v20, %v2307_v31  ;;  %v2300_v20 = vmax.f32 %v2298_v61, %v2299_v43 }
 0x36d   :  { %v1602_v5 = vpop.f32.mrf.mxu2 }
 0x36e   :  { %v1603_v13 = vadd.f32 %v4077_v11, %v1602_v5  ;;  %v2309_v51 = vrot.slane %v2308_v37, 2  ;;  %v2305_v5 = vrot.slane %v2304_v10, 1 }
 0x370   :  { %v1810_v21 = vmax.f32 %v1603_v13, 0.0  ;;  %v4128_v34 = vpop.f32.mrf.mxu3  ;;  %v2310_v50 = vmax.f32 %v2308_v37, %v2309_v51  ;;  %v2306_v16 = vmax.f32 %v2304_v10, %v2305_v5  ;;  %v3413_v51 = vld [vmem:[%s4345_s0 + $0x1e8] sm:$0xff] }
 0x372   :  { %3334 = vmatmul.msk.bf16.gmra.mxu2 %vm1213_vm2, %v1175_v6  ;;  %v2313_v12 = vrot.slane %v1810_v21, 4  ;;  %v2311_v58 = vrot.slane %v2310_v50, 1 }
 0x374   :  { %v2314_v19 = vmax.f32 %v1810_v21, %v2313_v12  ;;  %v927_v12 = vadd.f32 %v4026_v60, %v4107_v0 }
 0x375   :  { %v1605_v41 = vpop.f32.mrf.mxu2  ;;  %3275 = vmatmul.msk.bf16.gmra.mxu3 %vm475_vm1, %v3411_v40 }
 0x376   :  { %v1606_v17 = vadd.f32 %v4077_v11, %v1605_v41  ;;  %v2315_v52 = vrot.slane %v2314_v19, 2  ;;  %v1099_v40 = vmax.f32 %v927_v12, 0.0  ;;  %v3415_v12 = vld [vmem:[%s4345_s0 + $0x1f8] sm:$0xff] }
 0x378   :  { %v1811_v27 = vmax.f32 %v1606_v17, 0.0  ;;  %v4138_v18 = vpop.f32.mrf.mxu3  ;;  %v2316_v25 = vmax.f32 %v2314_v19, %v2315_v52  ;;  %v932_v52 = vadd.f32 %v4026_v60, %v4124_v32  ;;  %v3414_v32 = vld [vmem:[%s4345_s0 + $0x1f0] sm:$0xff] }
 0x37a   :  { %v2319_v33 = vrot.slane %v1811_v27, 4  ;;  %v2317_v7 = vrot.slane %v2316_v25, 1 }
 0x37c   :  { %v2320_v42 = vmax.f32 %v1811_v27, %v2319_v33  ;;  %v2318_v26 = vmax.f32 %v2316_v25, %v2317_v7  ;;  %v929_v33 = vadd.f32 %v4026_v60, %v4110_v8 }
 0x37d   :  { %v1607_v48 = vpop.f32.mrf.mxu2 }
 0x37e   :  { %v1608_v24 = vadd.f32 %v4077_v11, %v1607_v48  ;;  %v2321_v54 = vrot.slane %v2320_v42, 2  ;;  %v2312_v48 = vmax.f32 %v2310_v50, %v2311_v58  ;;  %v1100_v23 = vmax.f32 %v929_v33, 0.0 }
 0x380   :  { %v1812_v47 = vmax.f32 %v1608_v24, 0.0  ;;  %v2322_v6 = vmax.f32 %v2320_v42, %v2321_v54  ;;  %v938_v46 = vpop.f32.mrf.mxu3  ;;  %v1178_v45 = vpack.c.bf16 %v1100_v23, %v1099_v40  ;;  %v1101_v54 = vmax.f32 %v932_v52, 0.0 }
 0x382   :  { %3335 = vmatmul.msk.bf16.gmra.mxu2 %vm1213_vm2, %v1176_v28  ;;  %v2325_v35 = vrot.slane %v1812_v47, 4  ;;  %v2323_v17 = vrot.slane %v2322_v6, 1  ;;  %v3412_v28 = vld [vmem:[%s4345_s0 + $0x1e0] sm:$0xff] }
 0x384   :  { %v2326_v44 = vmax.f32 %v1812_v47, %v2325_v35  ;;  %v2829_v47 = vsel %vm2759_vm3, %v2306_v16, %v2300_v20  ;;  %v2324_v30 = vmax.f32 %v2322_v6, %v2323_v17 }
 0x385   :  { %v1610_v63 = vpop.f32.mrf.mxu2  ;;  %3276 = vmatmul.msk.bf16.gmra.mxu3 %vm475_vm1, %v3412_v28  ;;  %v2830_v35 = vsel %vm2761_vm4, %v2312_v48, %v2829_v47 }
 0x386   :  { %v1611_v39 = vadd.f32 %v4077_v11, %v1610_v63  ;;  %v2327_v55 = vrot.slane %v2326_v44, 2  ;;  %v2831_v63 = vsel %vm2763_vm5, %v2318_v26, %v2830_v35 }
 0x387   :  { %v2832_v19 = vsel %vm2765_vm6, %v2324_v30, %v2831_v63 }
 0x388   :  { %v1813_v29 = vmax.f32 %v1611_v39, 0.0  ;;  %v2328_v41 = vmax.f32 %v2326_v44, %v2327_v55  ;;  %v4154_v39 = vpop.f32.mrf.mxu3 }
 0x389   :  { %v942_v35 = vadd.f32 %v4026_v60, %v4154_v39 }
 0x38a   :  { %v2331_v53 = vrot.slane %v1813_v29, 4  ;;  %v2329_v1 = vrot.slane %v2328_v41, 1 }
 0x38c   :  { %v2332_v59 = vmax.f32 %v1813_v29, %v2331_v53  ;;  %v2330_v31 = vmax.f32 %v2328_v41, %v2329_v1  ;;  %v934_v53 = vadd.f32 %v4026_v60, %v4128_v34  ;;  %v937_v34 = vadd.f32 %v4026_v60, %v4138_v18 }
 0x38d   :  { %v1612_v62 = vpop.f32.mrf.mxu2 }
 0x38e   :  { %v2333_v56 = vrot.slane %v2332_v59, 2  ;;  %v1613_v3 = vadd.f32 %v4077_v11, %v1612_v62  ;;  %v2833_v0 = vsel %vm2767_vm7, %v2330_v31, %v2832_v19  ;;  %v1102_v22 = vmax.f32 %v934_v53, 0.0 }
 0x38f   :  { %v939_v62 = vadd.f32 %v4026_v60, %v938_v46 }
 0x390   :  { %v1814_v2 = vmax.f32 %v1613_v3, 0.0  ;;  %v2334_v9 = vmax.f32 %v2332_v59, %v2333_v56  ;;  %v943_v29 = vpop.f32.mrf.mxu3  ;;  %v1179_v57 = vpack.c.bf16 %v1102_v22, %v1101_v54 }
 0x392   :  { %v2337_v13 = vrot.slane %v1814_v2, 4  ;;  %3336 = vmatmul.msk.bf16.gmra.mxu2 %vm1213_vm2, %v1177_v38  ;;  %v2335_v21 = vrot.slane %v2334_v9, 1  ;;  %v1103_v38 = vmax.f32 %v937_v34, 0.0 }
 0x394   :  { %v2338_v4 = vmax.f32 %v1814_v2, %v2337_v13  ;;  %v2336_v36 = vmax.f32 %v2334_v9, %v2335_v21  ;;  %v1104_v2 = vmax.f32 %v939_v62, 0.0 }
 0x395   :  { %v1615_v24 = vpop.f32.mrf.mxu2  ;;  %3277 = vmatmul.msk.bf16.gmra.mxu3 %vm475_vm1, %v3413_v51 }
 0x396   :  { %v2339_v27 = vrot.slane %v2338_v4, 2  ;;  %v2834_v8 = vsel %vm2769_vm8, %v2336_v36, %v2833_v0  ;;  %v1616_v25 = vadd.f32 %v4077_v11, %v1615_v24  ;;  %v1180_v17 = vpack.c.bf16 %v1104_v2, %v1103_v38 }
 0x398   :  { %v2340_v15 = vmax.f32 %v2338_v4, %v2339_v27  ;;  %v4168_v10 = vpop.f32.mrf.mxu3  ;;  %v1815_v43 = vmax.f32 %v1616_v25, 0.0 }
 0x39a   :  { %v2341_v37 = vrot.slane %v2340_v15, 1  ;;  %v2343_v1 = vrot.slane %v1815_v43, 4 }
 0x39c   :  { %v2342_v42 = vmax.f32 %v2340_v15, %v2341_v37  ;;  %v2344_v27 = vmax.f32 %v1815_v43, %v2343_v1  ;;  %v944_v37 = vadd.f32 %v4026_v60, %v943_v29 }
 0x39d   :  { %v1617_v14 = vpop.f32.mrf.mxu2 }
 0x39e   :  { %v2835_v44 = vsel %vm2771_vm9, %v2342_v42, %v2834_v8  ;;  %v1618_v50 = vadd.f32 %v4077_v11, %v1617_v14  ;;  %v2345_v19 = vrot.slane %v2344_v27, 2 }
 0x39f   :  { %2903 = vxpose.xlu0.b32.cont [10/16] %v2835_v44, 128  ;;  %v1105_v44 = vmax.f32 %v942_v35, 0.0 }
 0x3a0   :  { %v4171_v59 = vpop.f32.mrf.mxu3  ;;  %v1816_v5 = vmax.f32 %v1618_v50, 0.0  ;;  %v2346_v52 = vmax.f32 %v2344_v27, %v2345_v19 }
 0x3a2   :  { %3337 = vmatmul.msk.bf16.gmra.mxu2 %vm1213_vm2, %v1178_v45  ;;  %v2349_v13 = vrot.slane %v1816_v5, 4  ;;  %v2347_v34 = vrot.slane %v2346_v52, 1 }
 0x3a4   :  { %v2350_v48 = vmax.f32 %v1816_v5, %v2349_v13  ;;  %v2348_v43 = vmax.f32 %v2346_v52, %v2347_v34 }
 0x3a5   :  { %v1620_v49 = vpop.f32.mrf.mxu2  ;;  %3278 = vmatmul.msk.bf16.gmra.mxu3 %vm475_vm1, %v3414_v32 }
 0x3a6   :  { %v1621_v56 = vadd.f32 %v4077_v11, %v1620_v49  ;;  %v2351_v15 = vrot.slane %v2350_v48, 2  ;;  %v1106_v49 = vmax.f32 %v944_v37, 0.0 }
 0x3a8   :  { %v4185_v41 = vpop.f32.mrf.mxu3  ;;  %v1817_v58 = vmax.f32 %v1621_v56, 0.0  ;;  %v2352_v0 = vmax.f32 %v2350_v48, %v2351_v15  ;;  %v1181_v32 = vpack.c.bf16 %v1106_v49, %v1105_v44  ;;  %v949_v48 = vadd.f32 %v4026_v60, %v4171_v59 }
 0x3aa   :  { %v2355_v4 = vrot.slane %v1817_v58, 4 }
 0x3ac   :  { %v2356_v28 = vmax.f32 %v1817_v58, %v2355_v4  ;;  %v947_v4 = vadd.f32 %v4026_v60, %v4168_v10 }
 0x3ad   :  { %v1622_v55 = vpop.f32.mrf.mxu2 }
 0x3ae   :  { %v1623_v3 = vadd.f32 %v4077_v11, %v1622_v55  ;;  %v2357_v40 = vrot.slane %v2356_v28, 2  ;;  %v2353_v55 = vrot.slane %v2352_v0, 1 }
 0x3b0   :  { %v1818_v9 = vmax.f32 %v1623_v3, 0.0  ;;  %v4189_v24 = vpop.f32.mrf.mxu3  ;;  %v2358_v39 = vmax.f32 %v2356_v28, %v2357_v40  ;;  %v2354_v5 = vmax.f32 %v2352_v0, %v2353_v55 }
 0x3b1   :  { %v954_v19 = vadd.f32 %v4026_v60, %v4189_v24 }
 0x3b2   :  { %3338 = vmatmul.msk.bf16.gmra.mxu2 %vm1213_vm2, %v1179_v57  ;;  %v2361_v20 = vrot.slane %v1818_v9, 4  ;;  %v2359_v62 = vrot.slane %v2358_v39, 1 }
 0x3b4   :  { %v2362_v30 = vmax.f32 %v1818_v9, %v2361_v20  ;;  %v2360_v58 = vmax.f32 %v2358_v39, %v2359_v62 }
 0x3b5   :  { %v1625_v61 = vpop.f32.mrf.mxu2  ;;  %3279 = vmatmul.msk.bf16.gmra.mxu3 %vm475_vm1, %v3415_v12 }
 0x3b6   :  { %v1626_v6 = vadd.f32 %v4077_v11, %v1625_v61  ;;  %v2363_v23 = vrot.slane %v2362_v30, 2 }
 0x3b8   :  { %v1819_v16 = vmax.f32 %v1626_v6, 0.0  ;;  %v4199_v8 = vpop.f32.mrf.mxu3  ;;  %v2364_v54 = vmax.f32 %v2362_v30, %v2363_v23  ;;  %v1107_v30 = vmax.f32 %v947_v4, 0.0 }
 0x3ba   :  { %v2367_v21 = vrot.slane %v1819_v16, 4  ;;  %v2365_v56 = vrot.slane %v2364_v54, 1 }
 0x3bc   :  { %v2368_v33 = vmax.f32 %v1819_v16, %v2367_v21  ;;  %v2366_v13 = vmax.f32 %v2364_v54, %v2365_v56 }
 0x3bd   :  { %v1627_v18 = vpop.f32.mrf.mxu2 }
 0x3be   :  { %v1628_v7 = vadd.f32 %v4077_v11, %v1627_v18  ;;  %v2369_v14 = vrot.slane %v2368_v33, 2 }
 0x3c0   :  { %v1820_v46 = vmax.f32 %v1628_v7, 0.0  ;;  %v2370_v57 = vmax.f32 %v2368_v33, %v2369_v14  ;;  %v958_v7 = vpop.f32.mrf.mxu3 }
 0x3c2   :  { %3339 = vmatmul.msk.bf16.gmra.mxu2 %vm1213_vm2, %v1180_v17  ;;  %v2373_v26 = vrot.slane %v1820_v46, 4  ;;  %v2371_v6 = vrot.slane %v2370_v57, 1  ;;  %v2836_v17 = vsel %vm2759_vm3, %v2354_v5, %v2348_v43 }
 0x3c3   :  { %v2837_v21 = vsel %vm2761_vm4, %v2360_v58, %v2836_v17 }
 0x3c4   :  { %v2374_v36 = vmax.f32 %v1820_v46, %v2373_v26  ;;  %v2372_v46 = vmax.f32 %v2370_v57, %v2371_v6  ;;  %v2838_v28 = vsel %vm2763_vm5, %v2366_v13, %v2837_v21 }
 0x3c5   :  { %v1630_v47 = vpop.f32.mrf.mxu2 }
 0x3c6   :  { %v1631_v31 = vadd.f32 %v4077_v11, %v1630_v47  ;;  %v2375_v45 = vrot.slane %v2374_v36, 2  ;;  %v2839_v47 = vsel %vm2765_vm6, %v2372_v46, %v2838_v28 }
 0x3c8   :  { %v1821_v63 = vmax.f32 %v1631_v31, 0.0  ;;  %v2376_v61 = vmax.f32 %v2374_v36, %v2375_v45  ;;  %v1108_v31 = vmax.f32 %v949_v48, 0.0  ;;  %v961_v59 = vpop.f32.mrf.mxu3 }
 0x3ca   :  { %v2379_v42 = vrot.slane %v1821_v63, 4  ;;  %v2377_v38 = vrot.slane %v2376_v61, 1  ;;  %v1182_v36 = vpack.c.bf16 %v1108_v31, %v1107_v30 }
 0x3cc   :  { %v2380_v51 = vmax.f32 %v1821_v63, %v2379_v42  ;;  %v2378_v1 = vmax.f32 %v2376_v61, %v2377_v38  ;;  %v952_v63 = vadd.f32 %v4026_v60, %v4185_v41  ;;  %v1110_v42 = vmax.f32 %v954_v19, 0.0 }
 0x3cd   :  { %v1632_v53 = vpop.f32.mrf.mxu2  ;;  %v959_v41 = vadd.f32 %v4026_v60, %v958_v7 }
 0x3ce   :  { %v2381_v29 = vrot.slane %v2380_v51, 2  ;;  %v1633_v22 = vadd.f32 %v4077_v11, %v1632_v53  ;;  %v2840_v15 = vsel %vm2767_vm7, %v2378_v1, %v2839_v47  ;;  %v1109_v23 = vmax.f32 %v952_v63, 0.0 }
 0x3cf   :  { %v962_v1 = vadd.f32 %v4026_v60, %v961_v59 }
 0x3d0   :  { %v1822_v50 = vmax.f32 %v1633_v22, 0.0  ;;  %v2382_v25 = vmax.f32 %v2380_v51, %v2381_v29  ;;  %v963_v40 = vpop.f32.mrf.mxu3  ;;  %v1183_v14 = vpack.c.bf16 %v1110_v42, %v1109_v23  ;;  %v957_v51 = vadd.f32 %v4026_v60, %v4199_v8 }
 0x3d1   :  { %v1112_v22 = vmax.f32 %v959_v41, 0.0  ;;  %v1113_v31 = vmax.f32 %v962_v1, 0.0 }
 0x3d2   :  { %v2385_v3 = vrot.slane %v1822_v50, 4  ;;  %3340 = vmatmul.msk.bf16.gmra.mxu2 %vm1213_vm2, %v1181_v32  ;;  %v2383_v18 = vrot.slane %v2382_v25, 1  ;;  %v1111_v29 = vmax.f32 %v957_v51, 0.0 }
 0x3d4   :  { %v2386_v2 = vmax.f32 %v1822_v50, %v2385_v3  ;;  %v2384_v26 = vmax.f32 %v2382_v25, %v2383_v18  ;;  %v1184_v25 = vpack.c.bf16 %v1112_v22, %v1111_v29 }
 0x3d5   :  { %v1635_v9 = vpop.f32.mrf.mxu2 }
 0x3d6   :  { %v2387_v16 = vrot.slane %v2386_v2, 2  ;;  %v2841_v10 = vsel %vm2769_vm8, %v2384_v26, %v2840_v15  ;;  %v1636_v52 = vadd.f32 %v4077_v11, %v1635_v9 }
 0x3d8   :  { %v2388_v20 = vmax.f32 %v2386_v2, %v2387_v16  ;;  %v4220_v44 = vpop.f32.mrf.mxu3  ;;  %v1823_v55 = vmax.f32 %v1636_v52, 0.0 }
 0x3da   :  { %v2389_v27 = vrot.slane %v2388_v20, 1  ;;  %v2391_v3 = vrot.slane %v1823_v55, 4 }
 0x3dc   :  { %v2390_v12 = vmax.f32 %v2388_v20, %v2389_v27  ;;  %v2392_v58 = vmax.f32 %v1823_v55, %v2391_v3  ;;  %v964_v20 = vadd.f32 %v4026_v60, %v963_v40 }
 0x3dd   :  { %v1637_v33 = vpop.f32.mrf.mxu2 }
 0x3de   :  { %v2842_v35 = vsel %vm2771_vm9, %v2390_v12, %v2841_v10  ;;  %v1638_v49 = vadd.f32 %v4077_v11, %v1637_v33  ;;  %v2393_v21 = vrot.slane %v2392_v58, 2  ;;  %v1114_v15 = vmax.f32 %v964_v20, 0.0 }
 0x3df   :  { %2904 = vxpose.xlu0.b32.cont [11/16] %v2842_v35, 128 }
 0x3e0   :  { %v1824_v53 = vmax.f32 %v1638_v49, 0.0  ;;  %v4230_v32 = vpop.f32.mrf.mxu3  ;;  %v2394_v10 = vmax.f32 %v2392_v58, %v2393_v21  ;;  %v1185_v42 = vpack.c.bf16 %v1114_v15, %v1113_v31 }
 0x3e1   :  { %v969_v3 = vadd.f32 %v4026_v60, %v4230_v32 }
 0x3e2   :  { %3341 = vmatmul.msk.bf16.gmra.mxu2 %vm1213_vm2, %v1182_v36  ;;  %v2397_v34 = vrot.slane %v1824_v53, 4 }
 0x3e4   :  { %v2398_v38 = vmax.f32 %v1824_v53, %v2397_v34 }
 0x3e5   :  { %v1640_v37 = vpop.f32.mrf.mxu2 }
 0x3e6   :  { %v1641_v24 = vadd.f32 %v4077_v11, %v1640_v37  ;;  %v2399_v16 = vrot.slane %v2398_v38, 2 }
 0x3e8   :  { %v1825_v57 = vmax.f32 %v1641_v24, 0.0  ;;  %v4235_v46 = vpop.f32.mrf.mxu3  ;;  %v2400_v47 = vmax.f32 %v2398_v38, %v2399_v16 }
 0x3e9   :  { %v972_v20 = vadd.f32 %v4026_v60, %v4235_v46 }
 0x3ea   :  { %v2403_v5 = vrot.slane %v1825_v57, 4  ;;  %v2401_v19 = vrot.slane %v2400_v47, 1 }
 0x3eb   :  { %v1117_v21 = vmax.f32 %v972_v20, 0.0 }
 0x3ec   :  { %v2404_v18 = vmax.f32 %v1825_v57, %v2403_v5  ;;  %v2402_v24 = vmax.f32 %v2400_v47, %v2401_v19 }
 0x3ed   :  { %v1642_v0 = vpop.f32.mrf.mxu2 }
 0x3ee   :  { %v1643_v39 = vadd.f32 %v4077_v11, %v1642_v0  ;;  %v2405_v26 = vrot.slane %v2404_v18, 2 }
 0x3f0   :  { %v1826_v50 = vmax.f32 %v1643_v39, 0.0  ;;  %v2406_v35 = vmax.f32 %v2404_v18, %v2405_v26  ;;  %v973_v51 = vpop.f32.mrf.mxu3 }
 0x3f2   :  { %3342 = vmatmul.msk.bf16.gmra.mxu2 %vm1213_vm2, %v1183_v14  ;;  %v2409_v6 = vrot.slane %v1826_v50, 4  ;;  %v2395_v14 = vrot.slane %v2394_v10, 1 }
 0x3f4   :  { %v2410_v7 = vmax.f32 %v1826_v50, %v2409_v6  ;;  %v2396_v29 = vmax.f32 %v2394_v10, %v2395_v14 }
 0x3f5   :  { %v1645_v45 = vpop.f32.mrf.mxu2 }
 0x3f6   :  { %v1646_v54 = vadd.f32 %v4077_v11, %v1645_v45  ;;  %v2411_v27 = vrot.slane %v2410_v7, 2  ;;  %v2407_v45 = vrot.slane %v2406_v35, 1 }
 0x3f8   :  { %v1827_v62 = vmax.f32 %v1646_v54, 0.0  ;;  %v2412_v37 = vmax.f32 %v2410_v7, %v2411_v27  ;;  %v2408_v22 = vmax.f32 %v2406_v35, %v2407_v45  ;;  %v976_v58 = vpop.f32.mrf.mxu3 }
 0x3fa   :  { %v2415_v2 = vrot.slane %v1827_v62, 4  ;;  %v2413_v41 = vrot.slane %v2412_v37, 1 }
 0x3fc   :  { %v2416_v17 = vmax.f32 %v1827_v62, %v2415_v2 }
 0x3fd   :  { %v1647_v61 = vpop.f32.mrf.mxu2 }
 0x3fe   :  { %v1648_v8 = vadd.f32 %v4077_v11, %v1647_v61  ;;  %v2417_v30 = vrot.slane %v2416_v17, 2  ;;  %v2414_v61 = vmax.f32 %v2412_v37, %v2413_v41 }
 0x400   :  { %v1828_v56 = vmax.f32 %v1648_v8, 0.0  ;;  %v2418_v40 = vmax.f32 %v2416_v17, %v2417_v30  ;;  %v2843_v8 = vsel %vm2759_vm3, %v2402_v24, %v2396_v29 }
 0x401   :  { %v2844_v5 = vsel %vm2761_vm4, %v2408_v22, %v2843_v8 }
 0x402   :  { %3343 = vmatmul.msk.bf16.gmra.mxu2 %vm1213_vm2, %v1184_v25  ;;  %v2421_v43 = vrot.slane %v1828_v56, 4  ;;  %v2419_v39 = vrot.slane %v2418_v40, 1  ;;  %v967_v25 = vadd.f32 %v4026_v60, %v4220_v44  ;;  %v2845_v2 = vsel %vm2763_vm5, %v2414_v61, %v2844_v5 }
 0x404   :  { %v2422_v4 = vmax.f32 %v1828_v56, %v2421_v43  ;;  %v2420_v34 = vmax.f32 %v2418_v40, %v2419_v39  ;;  %v1115_v18 = vmax.f32 %v967_v25, 0.0 }
 0x405   :  { %v1650_v9 = vpop.f32.mrf.mxu2 }
 0x406   :  { %v1651_v13 = vadd.f32 %v4077_v11, %v1650_v9  ;;  %v2423_v12 = vrot.slane %v2422_v4, 2  ;;  %v2846_v43 = vsel %vm2765_vm6, %v2420_v34, %v2845_v2  ;;  %v1116_v9 = vmax.f32 %v969_v3, 0.0  ;;  %v4270_v34 = vld [vmem:[%s4347_s2] ss:$0 sm:$0xff] }
 0x408   :  { %v1829_v48 = vmax.f32 %v1651_v13, 0.0  ;;  %v2424_v23 = vmax.f32 %v2422_v4, %v2423_v12  ;;  %v1186_v32 = vpack.c.bf16 %v1116_v9, %v1115_v18  ;;  %v978_v4 = vpop.f32.mrf.mxu3  ;;  %v977_v12 = vadd.f32 %v4026_v60, %v976_v58 }
 0x409   :  { %v979_v15 = vadd.f32 %v4026_v60, %v978_v4 }
 0x40a   :  { %v2427_v28 = vrot.slane %v1829_v48, 4  ;;  %v2425_v53 = vrot.slane %v2424_v23, 1 }
 0x40c   :  { %v2428_v33 = vmax.f32 %v1829_v48, %v2427_v28  ;;  %v2426_v62 = vmax.f32 %v2424_v23, %v2425_v53  ;;  %v974_v48 = vadd.f32 %v4026_v60, %v973_v51 }
 0x40d   :  { %v1652_v36 = vpop.f32.mrf.mxu2 }
 0x40e   :  { %v2429_v63 = vrot.slane %v2428_v33, 2  ;;  %v1653_v59 = vadd.f32 %v4077_v11, %v1652_v36  ;;  %v2847_v13 = vsel %vm2767_vm7, %v2426_v62, %v2846_v43  ;;  %v1118_v26 = vmax.f32 %v974_v48, 0.0 }
 0x410   :  { %v1830_v0 = vmax.f32 %v1653_v59, 0.0  ;;  %v2430_v49 = vmax.f32 %v2428_v33, %v2429_v63  ;;  %v981_v28 = vpop.f32.mrf.mxu3  ;;  %v1187_v47 = vpack.c.bf16 %v1118_v26, %v1117_v21  ;;  %v1119_v63 = vmax.f32 %v977_v12, 0.0 }
 0x411   :  { %v1120_v59 = vmax.f32 %v979_v15, 0.0  ;;  %v982_v62 = vadd.f32 %v4270_v34, %v981_v28 }
 0x412   :  { %v2433_v52 = vrot.slane %v1830_v0, 4  ;;  %3344 = vmatmul.msk.bf16.gmra.mxu2 %vm1213_vm2, %v1185_v42  ;;  %v2431_v55 = vrot.slane %v2430_v49, 1 }
 0x413   :  { %v1188_v45 = vpack.c.bf16 %v1120_v59, %v1119_v63  ;;  %v1121_v18 = vmax.f32 %v982_v62, 0.0 }
 0x414   :  { %v2434_v54 = vmax.f32 %v1830_v0, %v2433_v52  ;;  %v2432_v6 = vmax.f32 %v2430_v49, %v2431_v55 }
 0x415   :  { %v1655_v57 = vpop.f32.mrf.mxu2 }
 0x416   :  { %v2435_v50 = vrot.slane %v2434_v54, 2  ;;  %v2848_v44 = vsel %vm2769_vm8, %v2432_v6, %v2847_v13  ;;  %v1656_v33 = vadd.f32 %v4077_v11, %v1655_v57 }
 0x418   :  { %v2436_v56 = vmax.f32 %v2434_v54, %v2435_v50  ;;  %v983_v10 = vpop.f32.mrf.mxu3  ;;  %v1831_v19 = vmax.f32 %v1656_v33, 0.0 }
 0x41a   :  { %v2437_v38 = vrot.slane %v2436_v56, 1  ;;  %v2439_v51 = vrot.slane %v1831_v19, 4 }
 0x41c   :  { %v2438_v7 = vmax.f32 %v2436_v56, %v2437_v38  ;;  %v2440_v29 = vmax.f32 %v1831_v19, %v2439_v51  ;;  %v984_v56 = vadd.f32 %v4270_v34, %v983_v10 }
 0x41d   :  { %v1657_v16 = vpop.f32.mrf.mxu2 }
 0x41e   :  { %v2849_v17 = vsel %vm2771_vm9, %v2438_v7, %v2848_v44  ;;  %v1658_v31 = vadd.f32 %v4077_v11, %v1657_v16  ;;  %v2441_v5 = vrot.slane %v2440_v29, 2  ;;  %v1122_v7 = vmax.f32 %v984_v56, 0.0 }
 0x41f   :  { %2905 = vxpose.xlu0.b32.cont [12/16] %v2849_v17, 128 }
 0x420   :  { %v1832_v36 = vmax.f32 %v1658_v31, 0.0  ;;  %v986_v53 = vpop.f32.mrf.mxu3  ;;  %v2442_v16 = vmax.f32 %v2440_v29, %v2441_v5 }
 0x422   :  { %3345 = vmatmul.msk.bf16.gmra.mxu2 %vm1213_vm2, %v1186_v32  ;;  %v2445_v14 = vrot.slane %v1832_v36, 4 }
 0x424   :  { %v2446_v24 = vmax.f32 %v1832_v36, %v2445_v14  ;;  %v987_v14 = vadd.f32 %v4270_v34, %v986_v53 }
 0x425   :  { %v1660_v1 = vpop.f32.mrf.mxu2 }
 0x426   :  { %v1661_v46 = vadd.f32 %v4077_v11, %v1660_v1  ;;  %v2447_v50 = vrot.slane %v2446_v24, 2 }
 0x428   :  { %v1833_v40 = vmax.f32 %v1661_v46, 0.0  ;;  %v2448_v43 = vmax.f32 %v2446_v24, %v2447_v50  ;;  %v988_v32 = vpop.f32.mrf.mxu3 }
 0x42a   :  { %v2451_v41 = vrot.slane %v1833_v40, 4  ;;  %v2449_v48 = vrot.slane %v2448_v43, 1 }
 0x42c   :  { %v2452_v22 = vmax.f32 %v1833_v40, %v2451_v41  ;;  %v2450_v33 = vmax.f32 %v2448_v43, %v2449_v48 }
 0x42d   :  { %v1662_v27 = vpop.f32.mrf.mxu2 }
 0x42e   :  { %v1663_v35 = vadd.f32 %v4077_v11, %v1662_v27  ;;  %v2453_v6 = vrot.slane %v2452_v22, 2  ;;  %v1189_v27 = vpack.c.bf16 %v1122_v7, %v1121_v18 }
 0x430   :  { %v1834_v42 = vmax.f32 %v1663_v35, 0.0  ;;  %v2454_v44 = vmax.f32 %v2452_v22, %v2453_v6 }
 0x432   :  { %3346 = vmatmul.msk.bf16.gmra.mxu2 %vm1213_vm2, %v1187_v47  ;;  %v2457_v52 = vrot.slane %v1834_v42, 4  ;;  %v2443_v47 = vrot.slane %v2442_v16, 1 }
 0x434   :  { %v2458_v57 = vmax.f32 %v1834_v42, %v2457_v52  ;;  %v2444_v36 = vmax.f32 %v2442_v16, %v2443_v47  ;;  %v991_v42 = vpop.f32.mrf.mxu3 }
 0x435   :  { %v1665_v30 = vpop.f32.mrf.mxu2  ;;  %v992_v62 = vadd.f32 %v4270_v34, %v991_v42 }
 0x436   :  { %v1666_v37 = vadd.f32 %v4077_v11, %v1665_v30  ;;  %v2459_v38 = vrot.slane %v2458_v57, 2  ;;  %v2455_v30 = vrot.slane %v2454_v44, 1  ;;  %v2850_v40 = vsel %vm2759_vm3, %v2450_v33, %v2444_v36 }
 0x438   :  { %v1835_v60 = vmax.f32 %v1666_v37, 0.0  ;;  %v2460_v1 = vmax.f32 %v2458_v57, %v2459_v38  ;;  %v2456_v37 = vmax.f32 %v2454_v44, %v2455_v30 }
 0x43a   :  { %v2463_v39 = vrot.slane %v1835_v60, 4  ;;  %v2461_v12 = vrot.slane %v2460_v1, 1 }
 0x43c   :  { %v2464_v8 = vmax.f32 %v1835_v60, %v2463_v39  ;;  %v2462_v59 = vmax.f32 %v2460_v1, %v2461_v12  ;;  %v1123_v39 = vmax.f32 %v987_v14, 0.0  ;;  %v993_v50 = vpop.f32.mrf.mxu3 }
 0x43d   :  { %v1667_v23 = vpop.f32.mrf.mxu2 }
 0x43e   :  { %v1668_v0 = vadd.f32 %v4077_v11, %v1667_v23  ;;  %v2465_v58 = vrot.slane %v2464_v8, 2 }
 0x440   :  { %v1836_v49 = vmax.f32 %v1668_v0, 0.0  ;;  %v2466_v21 = vmax.f32 %v2464_v8, %v2465_v58  ;;  %v4292_v58 = vld [vmem:[%s4349_s4] ss:$0 sm:$0xff]  ;;  %s3458_s4 = smov [#allocation2]  }
 0x441   :  { %s2946_s30 = sshll.u32 %s3458_s4, 4  ;;  %s2947_s30 = int_to_ptr.vmem [resolvable:$true] %s2946_s30 }
 0x442   :  { %3347 = vmatmul.msk.bf16.gmra.mxu2 %vm1213_vm2, %v1188_v45  ;;  %v2469_v54 = vrot.slane %v1836_v49, 4  ;;  %v2467_v46 = vrot.slane %v2466_v21, 1  ;;  %v989_v45 = vadd.f32 %v4270_v34, %v988_v32 }
 0x444   :  { %v2470_v25 = vmax.f32 %v1836_v49, %v2469_v54  ;;  %v2468_v23 = vmax.f32 %v2466_v21, %v2467_v46  ;;  %v2851_v49 = vsel %vm2761_vm4, %v2456_v37, %v2850_v40  ;;  %v1124_v54 = vmax.f32 %v989_v45, 0.0  ;;  %v996_v56 = vpop.f32.mrf.mxu3 }
 0x445   :  { %v1670_v55 = vpop.f32.mrf.mxu2  ;;  %v2852_v52 = vsel %vm2763_vm5, %v2462_v59, %v2851_v49 }
 0x446   :  { %v1671_v61 = vadd.f32 %v4077_v11, %v1670_v55  ;;  %v2471_v9 = vrot.slane %v2470_v25, 2  ;;  %v2853_v24 = vsel %vm2765_vm6, %v2468_v23, %v2852_v52 }
 0x448   :  { %v1837_v3 = vmax.f32 %v1671_v61, 0.0  ;;  %v2472_v26 = vmax.f32 %v2470_v25, %v2471_v9  ;;  %v1190_v61 = vpack.c.bf16 %v1124_v54, %v1123_v39  ;;  %v994_v25 = vadd.f32 %v4270_v34, %v993_v50 }
 0x449   :  { %v997_v9 = vadd.f32 %v4270_v34, %v996_v56 }
 0x44a   :  { %v2475_v2 = vrot.slane %v1837_v3, 4  ;;  %v2473_v10 = vrot.slane %v2472_v26, 1  ;;  %v1126_v5 = vmax.f32 %v994_v25, 0.0 }
 0x44b   :  { %v1127_v1 = vmax.f32 %v997_v9, 0.0 }
 0x44c   :  { %v2476_v13 = vmax.f32 %v1837_v3, %v2475_v2  ;;  %v2474_v0 = vmax.f32 %v2472_v26, %v2473_v10  ;;  %v1125_v3 = vmax.f32 %v992_v62, 0.0  ;;  %v998_v2 = vpop.f32.mrf.mxu3 }
 0x44d   :  { %v1672_v17 = vpop.f32.mrf.mxu2  ;;  %v999_v7 = vadd.f32 %v4270_v34, %v998_v2 }
 0x44e   :  { %v2477_v4 = vrot.slane %v2476_v13, 2  ;;  %v1673_v20 = vadd.f32 %v4077_v11, %v1672_v17  ;;  %v2854_v22 = vsel %vm2767_vm7, %v2474_v0, %v2853_v24  ;;  %v1191_v38 = vpack.c.bf16 %v1126_v5, %v1125_v3 }
 0x450   :  { %v1838_v28 = vmax.f32 %v1673_v20, 0.0  ;;  %v2478_v31 = vmax.f32 %v2476_v13, %v2477_v4  ;;  %v1128_v4 = vmax.f32 %v999_v7, 0.0 }
 0x452   :  { %v2481_v15 = vrot.slane %v1838_v28, 4  ;;  %3348 = vmatmul.msk.bf16.gmra.mxu2 %vm1213_vm2, %v1189_v27  ;;  %v2479_v63 = vrot.slane %v2478_v31, 1  ;;  %v1192_v34 = vpack.c.bf16 %v1128_v4, %v1127_v1 }
 0x454   :  { %v2482_v35 = vmax.f32 %v1838_v28, %v2481_v15  ;;  %v2480_v51 = vmax.f32 %v2478_v31, %v2479_v63 }
 0x455   :  { %v1675_v11 = vpop.f32.mrf.mxu2 }
 0x456   :  { %v2483_v19 = vrot.slane %v2482_v35, 2  ;;  %v2855_v57 = vsel %vm2769_vm8, %v2480_v51, %v2854_v22  ;;  %v1676_v16 = vadd.f32 %v4292_v58, %v1675_v11 }
 0x458   :  { %v2484_v60 = vmax.f32 %v2482_v35, %v2483_v19  ;;  %v1839_v21 = vmax.f32 %v1676_v16, 0.0 }
 0x45a   :  { %v2485_v41 = vrot.slane %v2484_v60, 1  ;;  %v2487_v12 = vrot.slane %v1839_v21, 4 }
 0x45c   :  { %v2486_v29 = vmax.f32 %v2484_v60, %v2485_v41  ;;  %v2488_v37 = vmax.f32 %v1839_v21, %v2487_v12 }
 0x45d   :  { %v1677_v55 = vpop.f32.mrf.mxu2 }
 0x45e   :  { %v2856_v53 = vsel %vm2771_vm9, %v2486_v29, %v2855_v57  ;;  %v1678_v18 = vadd.f32 %v4292_v58, %v1677_v55  ;;  %v2489_v0 = vrot.slane %v2488_v37, 2 }
 0x45f   :  { %2906 = vxpose.xlu0.b32.cont [13/16] %v2856_v53, 128 }
 0x460   :  { %v1840_v32 = vmax.f32 %v1678_v18, 0.0  ;;  %v2490_v39 = vmax.f32 %v2488_v37, %v2489_v0 }
 0x462   :  { %3349 = vmatmul.msk.bf16.gmra.mxu2 %vm1213_vm2, %v1190_v61  ;;  %v2493_v47 = vrot.slane %v1840_v32, 4  ;;  %v2491_v62 = vrot.slane %v2490_v39, 1 }
 0x464   :  { %v2494_v46 = vmax.f32 %v1840_v32, %v2493_v47  ;;  %v2492_v9 = vmax.f32 %v2490_v39, %v2491_v62 }
 0x465   :  { %v1680_v8 = vpop.f32.mrf.mxu2 }
 0x466   :  { %v1681_v13 = vadd.f32 %v4292_v58, %v1680_v8  ;;  %v2495_v19 = vrot.slane %v2494_v46, 2 }
 0x468   :  { %v1841_v20 = vmax.f32 %v1681_v13, 0.0  ;;  %v2496_v49 = vmax.f32 %v2494_v46, %v2495_v19 }
 0x46a   :  { %v2499_v31 = vrot.slane %v1841_v20, 4  ;;  %v2497_v57 = vrot.slane %v2496_v49, 1 }
 0x46c   :  { %v2500_v35 = vmax.f32 %v1841_v20, %v2499_v31  ;;  %v2498_v5 = vmax.f32 %v2496_v49, %v2497_v57 }
 0x46d   :  { %v1682_v6 = vpop.f32.mrf.mxu2 }
 0x46e   :  { %v1683_v44 = vadd.f32 %v4292_v58, %v1682_v6  ;;  %v2501_v42 = vrot.slane %v2500_v35, 2 }
 0x470   :  { %v1842_v26 = vmax.f32 %v1683_v44, 0.0  ;;  %v2502_v52 = vmax.f32 %v2500_v35, %v2501_v42  ;;  %v2857_v44 = vsel %vm2759_vm3, %v2498_v5, %v2492_v9 }
 0x472   :  { %3350 = vmatmul.msk.bf16.gmra.mxu2 %vm1213_vm2, %v1191_v38  ;;  %v2505_v15 = vrot.slane %v1842_v26, 4  ;;  %v2503_v50 = vrot.slane %v2502_v52, 1 }
 0x474   :  { %v2506_v63 = vmax.f32 %v1842_v26, %v2505_v15  ;;  %v2504_v2 = vmax.f32 %v2502_v52, %v2503_v50 }
 0x475   :  { %v1685_v43 = vpop.f32.mrf.mxu2 }
 0x476   :  { %v1686_v17 = vadd.f32 %v4292_v58, %v1685_v43  ;;  %v2507_v14 = vrot.slane %v2506_v63, 2  ;;  %v2858_v1 = vsel %vm2761_vm4, %v2504_v2, %v2857_v44 }
 0x478   :  { %v1843_v28 = vmax.f32 %v1686_v17, 0.0  ;;  %v2508_v54 = vmax.f32 %v2506_v63, %v2507_v14 }
 0x47a   :  { %v2511_v33 = vrot.slane %v1843_v28, 4  ;;  %v2509_v25 = vrot.slane %v2508_v54, 1 }
 0x47c   :  { %v2512_v59 = vmax.f32 %v1843_v28, %v2511_v33  ;;  %v2510_v7 = vmax.f32 %v2508_v54, %v2509_v25 }
 0x47d   :  { %v1687_v48 = vpop.f32.mrf.mxu2 }
 0x47e   :  { %v1688_v27 = vadd.f32 %v4292_v58, %v1687_v48  ;;  %v2513_v45 = vrot.slane %v2512_v59, 2  ;;  %v2859_v48 = vsel %vm2763_vm5, %v2510_v7, %v2858_v1 }
 0x480   :  { %v1844_v30 = vmax.f32 %v1688_v27, 0.0  ;;  %v2514_v55 = vmax.f32 %v2512_v59, %v2513_v45 }
 0x482   :  { %3351 = vmatmul.msk.bf16.gmra.mxu2 %vm1213_vm2, %v1192_v34  ;;  %v2517_v10 = vrot.slane %v1844_v30, 4  ;;  %v2515_v3 = vrot.slane %v2514_v55, 1 }
 0x484   :  { %v2518_v40 = vmax.f32 %v1844_v30, %v2517_v10  ;;  %v2516_v16 = vmax.f32 %v2514_v55, %v2515_v3 }
 0x485   :  { %v1690_v36 = vpop.f32.mrf.mxu2 }
 0x486   :  { %v1691_v11 = vadd.f32 %v4292_v58, %v1690_v36  ;;  %v2519_v51 = vrot.slane %v2518_v40, 2  ;;  %v2860_v21 = vsel %vm2765_vm6, %v2516_v16, %v2859_v48 }
 0x488   :  { %v1845_v23 = vmax.f32 %v1691_v11, 0.0  ;;  %v2520_v53 = vmax.f32 %v2518_v40, %v2519_v51 }
 0x48a   :  { %v2523_v60 = vrot.slane %v1845_v23, 4  ;;  %v2521_v6 = vrot.slane %v2520_v53, 1 }
 0x48c   :  { %v2524_v41 = vmax.f32 %v1845_v23, %v2523_v60  ;;  %v2522_v17 = vmax.f32 %v2520_v53, %v2521_v6 }
 0x48d   :  { %v1692_v24 = vpop.f32.mrf.mxu2 }
 0x48e   :  { %v2525_v29 = vrot.slane %v2524_v41, 2  ;;  %v1693_v22 = vadd.f32 %v4292_v58, %v1692_v24  ;;  %v2861_v27 = vsel %vm2767_vm7, %v2522_v17, %v2860_v21 }
 0x490   :  { %v1846_v61 = vmax.f32 %v1693_v22, 0.0  ;;  %v2526_v8 = vmax.f32 %v2524_v41, %v2525_v29 }
 0x492   :  { %v2529_v56 = vrot.slane %v1846_v61, 4  ;;  %v2527_v43 = vrot.slane %v2526_v8, 1 }
 0x494   :  { %v2530_v38 = vmax.f32 %v1846_v61, %v2529_v56  ;;  %v2528_v4 = vmax.f32 %v2526_v8, %v2527_v43 }
 0x495   :  { %v1695_v18 = vpop.f32.mrf.mxu2 }
 0x496   :  { %v2531_v13 = vrot.slane %v2530_v38, 2  ;;  %v2862_v47 = vsel %vm2769_vm8, %v2528_v4, %v2861_v27  ;;  %v1696_v46 = vadd.f32 %v4292_v58, %v1695_v18 }
 0x498   :  { %v2532_v32 = vmax.f32 %v2530_v38, %v2531_v13  ;;  %v1847_v11 = vmax.f32 %v1696_v46, 0.0 }
 0x49a   :  { %v2533_v20 = vrot.slane %v2532_v32, 1  ;;  %v2535_v14 = vrot.slane %v1847_v11, 4 }
 0x49c   :  { %v2534_v26 = vmax.f32 %v2532_v32, %v2533_v20  ;;  %v2536_v24 = vmax.f32 %v1847_v11, %v2535_v14 }
 0x49d   :  { %v1697_v28 = vpop.f32.mrf.mxu2 }
 0x49e   :  { %v2863_v34 = vsel %vm2771_vm9, %v2534_v26, %v2862_v47  ;;  %v1698_v15 = vadd.f32 %v4292_v58, %v1697_v28  ;;  %v2537_v61 = vrot.slane %v2536_v24, 2 }
 0x49f   :  { %2907 = vxpose.xlu0.b32.cont [14/16] %v2863_v34, 128 }
 0x4a0   :  { %v1848_v36 = vmax.f32 %v1698_v15, 0.0  ;;  %v2538_v38 = vmax.f32 %v2536_v24, %v2537_v61 }
 0x4a2   :  { %v2541_v23 = vrot.slane %v1848_v36, 4  ;;  %v2539_v32 = vrot.slane %v2538_v38, 1 }
 0x4a4   :  { %v2542_v49 = vmax.f32 %v1848_v36, %v2541_v23  ;;  %v2540_v34 = vmax.f32 %v2538_v38, %v2539_v32 }
 0x4a5   :  { %v1700_v30 = vpop.f32.mrf.mxu2 }
 0x4a6   :  { %v1701_v33 = vadd.f32 %v4292_v58, %v1700_v30  ;;  %v2543_v22 = vrot.slane %v2542_v49, 2 }
 0x4a8   :  { %v1849_v37 = vmax.f32 %v1701_v33, 0.0  ;;  %v2544_v25 = vmax.f32 %v2542_v49, %v2543_v22 }
 0x4aa   :  { %v2547_v0 = vrot.slane %v1849_v37, 4  ;;  %v2545_v7 = vrot.slane %v2544_v25, 1 }
 0x4ac   :  { %v2548_v41 = vmax.f32 %v1849_v37, %v2547_v0  ;;  %v2546_v48 = vmax.f32 %v2544_v25, %v2545_v7 }
 0x4ad   :  { %v1702_v31 = vpop.f32.mrf.mxu2 }
 0x4ae   :  { %v1703_v10 = vadd.f32 %v4292_v58, %v1702_v31  ;;  %v2549_v53 = vrot.slane %v2548_v41, 2  ;;  %v2864_v15 = vsel %vm2759_vm3, %v2546_v48, %v2540_v34 }
 0x4b0   :  { %v1850_v59 = vmax.f32 %v1703_v10, 0.0  ;;  %v2550_v5 = vmax.f32 %v2548_v41, %v2549_v53 }
 0x4b2   :  { %v2553_v60 = vrot.slane %v1850_v59, 4  ;;  %v2551_v44 = vrot.slane %v2550_v5, 1 }
 0x4b4   :  { %v2554_v39 = vmax.f32 %v1850_v59, %v2553_v60  ;;  %v2552_v27 = vmax.f32 %v2550_v5, %v2551_v44 }
 0x4b5   :  { %v1705_v12 = vpop.f32.mrf.mxu2 }
 0x4b6   :  { %v1706_v35 = vadd.f32 %v4292_v58, %v1705_v12  ;;  %v2555_v50 = vrot.slane %v2554_v39, 2  ;;  %v2865_v10 = vsel %vm2761_vm4, %v2552_v27, %v2864_v15 }
 0x4b8   :  { %v1851_v40 = vmax.f32 %v1706_v35, 0.0  ;;  %v2556_v2 = vmax.f32 %v2554_v39, %v2555_v50 }
 0x4ba   :  { %v2559_v45 = vrot.slane %v1851_v40, 4  ;;  %v2557_v1 = vrot.slane %v2556_v2, 1 }
 0x4bc   :  { %v2560_v29 = vmax.f32 %v1851_v40, %v2559_v45  ;;  %v2558_v30 = vmax.f32 %v2556_v2, %v2557_v1 }
 0x4bd   :  { %v1707_v63 = vpop.f32.mrf.mxu2 }
 0x4be   :  { %v1708_v19 = vadd.f32 %v4292_v58, %v1707_v63  ;;  %v2561_v62 = vrot.slane %v2560_v29, 2  ;;  %v2866_v37 = vsel %vm2763_vm5, %v2558_v30, %v2865_v10 }
 0x4c0   :  { %v1852_v42 = vmax.f32 %v1708_v19, 0.0  ;;  %v2562_v9 = vmax.f32 %v2560_v29, %v2561_v62 }
 0x4c2   :  { %v2565_v51 = vrot.slane %v1852_v42, 4  ;;  %v2563_v20 = vrot.slane %v2562_v9, 1 }
 0x4c4   :  { %v2566_v55 = vmax.f32 %v1852_v42, %v2565_v51  ;;  %v2564_v12 = vmax.f32 %v2562_v9, %v2563_v20 }
 0x4c5   :  { %v1710_v52 = vpop.f32.mrf.mxu2 }
 0x4c6   :  { %v1711_v54 = vadd.f32 %v4292_v58, %v1710_v52  ;;  %v2567_v56 = vrot.slane %v2566_v55, 2  ;;  %v2867_v63 = vsel %vm2765_vm6, %v2564_v12, %v2866_v37 }
 0x4c8   :  { %v1853_v57 = vmax.f32 %v1711_v54, 0.0  ;;  %v2568_v13 = vmax.f32 %v2566_v55, %v2567_v56 }
 0x4ca   :  { %v2571_v8 = vrot.slane %v1853_v57, 4  ;;  %v2569_v21 = vrot.slane %v2568_v13, 1 }
 0x4cc   :  { %v2572_v3 = vmax.f32 %v1853_v57, %v2571_v8  ;;  %v2570_v33 = vmax.f32 %v2568_v13, %v2569_v21 }
 0x4cd   :  { %v1712_v6 = vpop.f32.mrf.mxu2 }
 0x4ce   :  { %v2573_v43 = vrot.slane %v2572_v3, 2  ;;  %v1713_v18 = vadd.f32 %v4292_v58, %v1712_v6  ;;  %v2868_v59 = vsel %vm2767_vm7, %v2570_v33, %v2867_v63 }
 0x4d0   :  { %v1854_v16 = vmax.f32 %v1713_v18, 0.0  ;;  %v2574_v17 = vmax.f32 %v2572_v3, %v2573_v43 }
 0x4d2   :  { %v2577_v4 = vrot.slane %v1854_v16, 4  ;;  %v2575_v28 = vrot.slane %v2574_v17, 1 }
 0x4d4   :  { %v2578_v26 = vmax.f32 %v1854_v16, %v2577_v4  ;;  %v2576_v35 = vmax.f32 %v2574_v17, %v2575_v28 }
 0x4d5   :  { %v1715_v47 = vpop.f32.mrf.mxu2 }
 0x4d6   :  { %v2579_v31 = vrot.slane %v2578_v26, 2  ;;  %v2869_v40 = vsel %vm2769_vm8, %v2576_v35, %v2868_v59  ;;  %v1716_v49 = vadd.f32 %v4292_v58, %v1715_v47 }
 0x4d8   :  { %v2580_v46 = vmax.f32 %v2578_v26, %v2579_v31  ;;  %v1855_v54 = vmax.f32 %v1716_v49, 0.0 }
 0x4da   :  { %v2581_v36 = vrot.slane %v2580_v46, 1  ;;  %v2583_v50 = vrot.slane %v1855_v54, 4 }
 0x4dc   :  { %v2582_v11 = vmax.f32 %v2580_v46, %v2581_v36  ;;  %v2584_v6 = vmax.f32 %v1855_v54, %v2583_v50 }
 0x4dd   :  { %v1717_v19 = vpop.f32.mrf.mxu2 }
 0x4de   :  { %v2870_v23 = vsel %vm2771_vm9, %v2582_v11, %v2869_v40  ;;  %v1718_v60 = vadd.f32 %v4292_v58, %v1717_v19  ;;  %v2585_v16 = vrot.slane %v2584_v6, 2 }
 0x4df   :  { %2908 = vxpose.xlu0.b32.cont [15/16] %v2870_v23, 128 }
 0x4e0   :  { %v1856_v52 = vmax.f32 %v1718_v60, 0.0  ;;  %v2586_v26 = vmax.f32 %v2584_v6, %v2585_v16 }
 0x4e2   :  { %v2589_v57 = vrot.slane %v1856_v52, 4  ;;  %v2587_v46 = vrot.slane %v2586_v26, 1 }
 0x4e4   :  { %v2590_v25 = vmax.f32 %v1856_v52, %v2589_v57  ;;  %v2588_v40 = vmax.f32 %v2586_v26, %v2587_v46 }
 0x4e5   :  { %v1720_v42 = vpop.f32.mrf.mxu2 }
 0x4e6   :  { %v1721_v45 = vadd.f32 %v4292_v58, %v1720_v42  ;;  %v2591_v18 = vrot.slane %v2590_v25, 2 }
 0x4e8   :  { %v1857_v24 = vmax.f32 %v1721_v45, 0.0  ;;  %v2592_v1 = vmax.f32 %v2590_v25, %v2591_v18 }
 0x4ea   :  { %v2595_v61 = vrot.slane %v1857_v24, 4  ;;  %v2593_v30 = vrot.slane %v2592_v1, 1 }
 0x4ec   :  { %v2596_v3 = vmax.f32 %v1857_v24, %v2595_v61  ;;  %v2594_v37 = vmax.f32 %v2592_v1, %v2593_v30 }
 0x4ed   :  { %v1722_v0 = vpop.f32.mrf.mxu2 }
 0x4ee   :  { %v1723_v51 = vadd.f32 %v4292_v58, %v1722_v0  ;;  %v2597_v13 = vrot.slane %v2596_v3, 2 }
 0x4f0   :  { %v1858_v29 = vmax.f32 %v1723_v51, 0.0  ;;  %v2598_v48 = vmax.f32 %v2596_v3, %v2597_v13 }
 0x4f2   :  { %v2601_v8 = vrot.slane %v1858_v29, 4  ;;  %v2599_v15 = vrot.slane %v2598_v48, 1 }
 0x4f4   :  { %v2602_v38 = vmax.f32 %v1858_v29, %v2601_v8  ;;  %v2600_v59 = vmax.f32 %v2598_v48, %v2599_v15 }
 0x4f5   :  { %v1725_v14 = vpop.f32.mrf.mxu2 }
 0x4f6   :  { %v1726_v41 = vadd.f32 %v4292_v58, %v1725_v14  ;;  %v2603_v44 = vrot.slane %v2602_v38, 2 }
 0x4f8   :  { %v1859_v55 = vmax.f32 %v1726_v41, 0.0  ;;  %v2604_v27 = vmax.f32 %v2602_v38, %v2603_v44 }
 0x4fa   :  { %v2607_v62 = vrot.slane %v1859_v55, 4  ;;  %v2605_v10 = vrot.slane %v2604_v27, 1 }
 0x4fc   :  { %v2608_v43 = vmax.f32 %v1859_v55, %v2607_v62  ;;  %v2606_v23 = vmax.f32 %v2604_v27, %v2605_v10 }
 0x4fd   :  { %v1727_v39 = vpop.f32.mrf.mxu2 }
 0x4fe   :  { %v1728_v22 = vadd.f32 %v4292_v58, %v1727_v39  ;;  %v2609_v32 = vrot.slane %v2608_v43, 2 }
 0x500   :  { %v1860_v53 = vmax.f32 %v1728_v22, 0.0  ;;  %v2610_v34 = vmax.f32 %v2608_v43, %v2609_v32 }
 0x502   :  { %v2613_v56 = vrot.slane %v1860_v53, 4  ;;  %v2611_v36 = vrot.slane %v2610_v34, 1 }
 0x504   :  { %v2614_v9 = vmax.f32 %v1860_v53, %v2613_v56  ;;  %v2612_v0 = vmax.f32 %v2610_v34, %v2611_v36 }
 0x505   :  { %v1730_v5 = vpop.f32.mrf.mxu2 }
 0x506   :  { %v1731_v2 = vadd.f32 %v4292_v58, %v1730_v5  ;;  %v2615_v4 = vrot.slane %v2614_v9, 2 }
 0x508   :  { %v1861_v7 = vmax.f32 %v1731_v2, 0.0  ;;  %v2616_v31 = vmax.f32 %v2614_v9, %v2615_v4 }
 0x50a   :  { %v2619_v17 = vrot.slane %v1861_v7, 4  ;;  %v2617_v63 = vrot.slane %v2616_v31, 1 }
 0x50c   :  { %v2620_v20 = vmax.f32 %v1861_v7, %v2619_v17  ;;  %v2618_v14 = vmax.f32 %v2616_v31, %v2617_v63 }
 0x50d   :  { %v1732_v21 = vpop.f32.mrf.mxu2 }
 0x50e   :  { %v2621_v28 = vrot.slane %v2620_v20, 2  ;;  %v1733_v47 = vadd.f32 %v4292_v58, %v1732_v21  ;;  %v2871_v58 = vsel %vm2759_vm3, %v2594_v37, %v2588_v40 }
 0x50f   :  { %v2872_v45 = vsel %vm2761_vm4, %v2600_v59, %v2871_v58 }
 0x510   :  { %v1862_v12 = vmax.f32 %v1733_v47, 0.0  ;;  %v2622_v33 = vmax.f32 %v2620_v20, %v2621_v28  ;;  %v2873_v41 = vsel %vm2763_vm5, %v2606_v23, %v2872_v45 }
 0x511   :  { %v2874_v52 = vsel %vm2765_vm6, %v2612_v0, %v2873_v41 }
 0x512   :  { %v2625_v35 = vrot.slane %v1862_v12, 4  ;;  %v2623_v19 = vrot.slane %v2622_v33, 1  ;;  %v2875_v39 = vsel %vm2767_vm7, %v2618_v14, %v2874_v52 }
 0x514   :  { %v2626_v11 = vmax.f32 %v1862_v12, %v2625_v35  ;;  %v2624_v49 = vmax.f32 %v2622_v33, %v2623_v19 }
 0x516   :  { %v2627_v42 = vrot.slane %v2626_v11, 2  ;;  %v2876_v54 = vsel %vm2769_vm8, %v2624_v49, %v2875_v39 }
 0x518   :  { %v2628_v60 = vmax.f32 %v2626_v11, %v2627_v42 }
 0x51a   :  { %v2629_v51 = vrot.slane %v2628_v60, 1 }
 0x51c   :  { %v2630_v24 = vmax.f32 %v2628_v60, %v2629_v51 }
 0x51e   :  { %v2877_v29 = vsel %vm2771_vm9, %v2630_v24, %v2876_v54 }
 0x51f   :  { %2909 = vxpose.xlu0.b32.end [16/16] %v2877_v29, 128 }
 0x54b   :  { %v2910_v22 = vpop.trf.xlu0 }
 0x54c   :  { %2926 = vst [vmem:[#allocation2] sm:$0xff] %v2910_v22 }
 0x553   :  { %v2911_v55 = vpop.trf.xlu0 }
 0x554   :  { %2927 = vst [vmem:[#allocation2 + $0x8] sm:$0xff] %v2911_v55 }
 0x55b   :  { %v2912_v57 = vpop.trf.xlu0 }
 0x55c   :  { %2928 = vst [vmem:[#allocation2 + $0x10] sm:$0xff] %v2912_v57 }
 0x563   :  { %v2913_v53 = vpop.trf.xlu0 }
 0x564   :  { %2929 = vst [vmem:[#allocation2 + $0x18] sm:$0xff] %v2913_v53 }
 0x56b   :  { %v2914_v61 = vpop.trf.xlu0 }
 0x56c   :  { %2930 = vst [vmem:[#allocation2 + $0x20] sm:$0xff] %v2914_v61 }
 0x573   :  { %v2915_v50 = vpop.trf.xlu0 }
 0x574   :  { %2931 = vst [vmem:[#allocation2 + $0x28] sm:$0xff] %v2915_v50 }
 0x57b   :  { %v2916_v8 = vpop.trf.xlu0 }
 0x57c   :  { %2932 = vst [vmem:[#allocation2 + $0x30] sm:$0xff] %v2916_v8 }
 0x583   :  { %v2917_v62 = vpop.trf.xlu0 }
 0x584   :  { %2933 = vst [vmem:[#allocation2 + $0x38] sm:$0xff] %v2917_v62 }
 0x58b   :  { %v2918_v25 = vpop.trf.xlu0 }
 0x58c   :  { %2934 = vst [vmem:[#allocation2 + $0x40] sm:$0xff] %v2918_v25 }
 0x593   :  { %v2919_v56 = vpop.trf.xlu0 }
 0x594   :  { %2935 = vst [vmem:[#allocation2 + $0x48] sm:$0xff] %v2919_v56 }
 0x59b   :  { %v2920_v3 = vpop.trf.xlu0 }
 0x59c   :  { %2936 = vst [vmem:[#allocation2 + $0x50] sm:$0xff] %v2920_v3 }
 0x5a3   :  { %v2921_v5 = vpop.trf.xlu0 }
 0x5a4   :  { %2937 = vst [vmem:[#allocation2 + $0x58] sm:$0xff] %v2921_v5 }
 0x5ab   :  { %v2922_v6 = vpop.trf.xlu0 }
 0x5ac   :  { %2938 = vst [vmem:[#allocation2 + $0x60] sm:$0xff] %v2922_v6 }
 0x5b3   :  { %v2923_v38 = vpop.trf.xlu0 }
 0x5b4   :  { %2939 = vst [vmem:[#allocation2 + $0x68] sm:$0xff] %v2923_v38 }
 0x5bb   :  { %v2924_v2 = vpop.trf.xlu0 }
 0x5bc   :  { %2940 = vst [vmem:[#allocation2 + $0x70] sm:$0xff] %v2924_v2 }
 0x5c3   :  { %v2925_v43 = vpop.trf.xlu0 }
 0x5c4   :  { %2941 = vst [vmem:[#allocation2 + $0x78] sm:$0xff] %v2925_v43 }
 0x5c5   :  { %2954 = dma.vmem_to_hbm [thread:$0]  %s2947_s30, 2048, %s2949_s8, [#allocation3], %s3459_s9, %s3459_s9, %s3460_s10  }
 0x5c6   :  { %3456 = dma.done.wait [#allocation3], 2048  }
 0x5c7   :  { %3457 = vsyncadd [#allocation3], 4294965248 }
 0x5c8   :  { %2959 = vsyncpa [#allocation3], 1 }

</bundles_post_ra>
